<compile_context>
chip_gen: v6e
topology: v6e:2x2x1
jax: 0.10.0
libtpu: 0.0.40
codegen_flags: <defaults>
</compile_context>

<pallas_src>
import functools

import jax
import jax.numpy as jnp
from jax import lax
from jax.experimental import pallas as pl
from jax.experimental.pallas import tpu as pltpu


# ---------------------------------------------------------------------------
# TPU-generation-aware sizing helpers
# ---------------------------------------------------------------------------
@functools.lru_cache(maxsize=None)
def _vmem_defaults():
    """(vmem_limit_bytes, per-tile byte budget), generation aware."""
    try:
        phys = int(pltpu.get_tpu_info().vmem_capacity_bytes)
    except Exception:                      # query unavailable -> conservative
        phys = 0
    if phys >= 128 * 1024 * 1024:          # v5e / v6e: 128 MiB physical VMEM
        return 64 * 1024 * 1024, 20 * 1024 * 1024
    return 32 * 1024 * 1024, 8 * 1024 * 1024   # v7x (64 MiB) or unknown


def _default_mac_dtype(storage_dtype):
    """bf16 depthwise MACs only where the VPU has packed bf16 (v6e / v7x)."""
    if storage_dtype != jnp.bfloat16:
        return jnp.float32                 # f32 activations: keep exact MACs
    try:
        kind = jax.devices()[0].device_kind.lower()
    except Exception:
        kind = ""
    if any(t in kind for t in ("v2", "v3", "v4", "v5")):
        return jnp.float32                 # no packed-bf16 VALU on <= v5e
    return jnp.bfloat16


def _pick_row_tile(h_out, w, c, requested=None):
    """Row tile: biggest that fits the per-tile VMEM budget.

    No divisor requirement any more: the grid uses cdiv(h_out, tile) and the
    ragged last tile is handled with masked boundary writes, so awkward image
    heights no longer collapse to TH=1.  A reasonably large exact divisor is
    still preferred when one exists (avoids the masked tail entirely).
    """
    if requested is not None:
        return max(1, min(h_out, int(requested)))
    _, budget = _vmem_defaults()
    per_row = 16 * (w + 4) * max(c, 1) * 4      # slabs + accs + matmul operands
    cap = max(1, min(h_out, budget // per_row))
    for d in range(cap, max(cap // 2, 0), -1):
        if h_out % d == 0:
            return d
    return cap


# ---------------------------------------------------------------------------
# Kernel 1: fused ResBlock (two stride-1 depthwise-separable convs + skip)
# ---------------------------------------------------------------------------
def _fused_resblock_kernel(x_ref, dw1_ref, db1_ref, pw1_ref, pb1_ref,
                           dw2_ref, db2_ref, pw2_ref, pb2_ref, out_ref,
                           *, img_h, mac_dtype):
    """One output row tile of: dsconv1 -> dsconv2 -> + residual.

    x_ref holds the whole 2-padded image (resident across the row-tile axis).
    The nine 3x3 taps of each conv are served from three dj-shifted slabs;
    the di offset is a leading-axis slice (no extra sublane relayout).
    """
    _, TH, W, C = out_ref.shape
    H = img_h                                   # real (unpadded) image height
    mxu_dtype = pw1_ref.dtype
    row0 = pl.multiple_of(pl.program_id(1) * TH, TH)

    # Per-tap depthwise weights, hoisted out of the MAC loops.
    w1 = dw1_ref[...].astype(mac_dtype)
    w2 = dw2_ref[...].astype(mac_dtype)
    w1_taps = [w1[k].reshape(1, 1, C) for k in range(9)]
    w2_taps = [w2[k].reshape(1, 1, C) for k in range(9)]

    # ---- dsconv #1 on a (TH+2, W+2) halo region (conv #2 needs a 1-px halo).
    # Three dj-shifted slabs; tap (di, dj) = x_slab[dj][di:di+TH+2].
    x_slab = [x_ref[0, pl.ds(row0, TH + 4), dj:dj + W + 2, :].astype(mac_dtype)
              for dj in range(3)]
    acc1 = jnp.zeros((TH + 2, W + 2, C), jnp.float32)
    for k in range(9):
        di, dj = k // 3, k % 3
        acc1 = acc1 + x_slab[dj][di:di + TH + 2] * w1_taps[k]
    acc1 = jnp.maximum(acc1 + db1_ref[...].reshape(1, 1, C), 0.0)
    h = jnp.dot(acc1.reshape((TH + 2) * (W + 2), C).astype(mxu_dtype),
                pw1_ref[...], preferred_element_type=jnp.float32)
    h = jnp.maximum(h + pb1_ref[...].reshape(1, C), 0.0)
    h = h.reshape(TH + 2, W + 2, C)

    # Halo pixels that fall in conv #2's zero padding (outside the image)
    # must be exactly zero.  Broadcastable 2D masks, no 3D iota temporaries.
    row_ids = lax.broadcasted_iota(jnp.int32, (TH + 2, 1, 1), 0) + (row0 - 1)
    col_ids = lax.broadcasted_iota(jnp.int32, (1, W + 2, 1), 1) - 1
    inside = (row_ids >= 0) & (row_ids < H) & (col_ids >= 0) & (col_ids < W)
    h = jnp.where(inside, h, 0.0).astype(mac_dtype)

    # ---- dsconv #2 on the (TH, W) tile, same 3-slab tap scheme.
    h_slab = [h[:, dj:dj + W, :] for dj in range(3)]
    acc2 = jnp.zeros((TH, W, C), jnp.float32)
    for k in range(9):
        di, dj = k // 3, k % 3
        acc2 = acc2 + h_slab[dj][di:di + TH] * w2_taps[k]
    acc2 = jnp.maximum(acc2 + db2_ref[...].reshape(1, 1, C), 0.0)
    y = jnp.dot(acc2.reshape(TH * W, C).astype(mxu_dtype),
                pw2_ref[...], preferred_element_type=jnp.float32)
    y = jnp.maximum(y + pb2_ref[...].reshape(1, C), 0.0).reshape(TH, W, C)

    # Residual: original x columns 0..W of the dj=2 slab (already in VMEM).
    res = x_slab[2][2:2 + TH, :W, :].astype(jnp.float32)
    out_ref[0] = (y + res).astype(out_ref.dtype)


def fused_res_block(x_nhwc, p1, p2, *, row_tile=None, mac_dtype=None):
    """ResBlock (two stride-1 DepthwiseSeparableConv + skip) in ONE pallas_call."""
    N, H, W, C = x_nhwc.shape
    cdt = x_nhwc.dtype
    if mac_dtype is None:
        mac_dtype = _default_mac_dtype(cdt)
    th = _pick_row_tile(H, W, C, row_tile)
    n_tiles = pl.cdiv(H, th)
    hp = n_tiles * th                       # grid-covered rows (>= H if ragged)

    # Pad ONCE: 2-px halo, plus extra zero rows at the bottom so the ragged
    # last tile's in-kernel reads stay inside the VMEM block.  No im2col.
    xp = jnp.pad(x_nhwc, ((0, 0), (2, hp - H + 2), (2, 2), (0, 0)))

    dw1, db1, pw1, pb1 = p1
    dw2, db2, pw2, pb2 = p2
    args = (
        xp,
        dw1.astype(jnp.float32), db1.reshape(1, C).astype(jnp.float32),
        pw1.astype(cdt), pb1.reshape(1, C).astype(jnp.float32),
        dw2.astype(jnp.float32), db2.reshape(1, C).astype(jnp.float32),
        pw2.astype(cdt), pb2.reshape(1, C).astype(jnp.float32),
    )

    w_spec = pl.BlockSpec((9, C), lambda n, r: (0, 0))
    b_spec = pl.BlockSpec((1, C), lambda n, r: (0, 0))
    p_spec = pl.BlockSpec((C, C), lambda n, r: (0, 0))
    in_specs = [
        # Full padded image, resident across the row-tile axis.
        pl.BlockSpec((1, hp + 4, W + 4, C), lambda n, r: (n, 0, 0, 0)),
        w_spec, b_spec, p_spec, b_spec,
        w_spec, b_spec, p_spec, b_spec,
    ]
    vmem_limit, _ = _vmem_defaults()
    kernel = functools.partial(_fused_resblock_kernel,
                               img_h=H, mac_dtype=mac_dtype)
    return pl.pallas_call(
        kernel,
        out_shape=jax.ShapeDtypeStruct((N, H, W, C), cdt),
        grid=(N, n_tiles),
        in_specs=in_specs,
        out_specs=pl.BlockSpec((1, th, W, C), lambda n, r: (n, r, 0, 0)),
        compiler_params=pltpu.CompilerParams(
            # Batch axis across TensorCores; row axis NOT sharded so both v7x
            # cores do not duplicate the resident padded-image DMA.
            dimension_semantics=("parallel", "arbitrary"),
            vmem_limit_bytes=vmem_limit),
    )(*args)


# ---------------------------------------------------------------------------
# Kernel 2: stride-2 depthwise-separable conv (downsample)
# ---------------------------------------------------------------------------
def _dsconv_stride2_kernel(p00_ref, p01_ref, p10_ref, p11_ref,
                           dw_ref, db_ref, pw_ref, pb_ref, out_ref,
                           *, mac_dtype):
    """Depthwise 3x3 stride-2 + ReLU + pointwise 1x1 + ReLU for one row tile.

    The wrapper pre-splits the padded input into four 2x2 phase arrays
    (space-to-depth); the nine taps are served from SIX hoisted
    (phase, column-shift) slabs, reused across the row offsets di//2.
    """
    _, THo, Wo, Cout = out_ref.shape
    Cin = dw_ref.shape[1]
    mxu_dtype = pw_ref.dtype
    row0 = pl.multiple_of(pl.program_id(1) * THo, THo)
    phases = (p00_ref, p01_ref, p10_ref, p11_ref)

    w = dw_ref[...].astype(mac_dtype)
    w_taps = [w[k].reshape(1, 1, Cin) for k in range(9)]

    slabs = {}
    for a in (0, 1):
        for b in (0, 1):
            for cs in ((0, 1) if b == 0 else (0,)):
                ref = phases[a * 2 + b]
                slabs[(a, b, cs)] = ref[0, pl.ds(row0, THo + 1),
                                        cs:cs + Wo, :].astype(mac_dtype)

    acc = jnp.zeros((THo, Wo, Cin), jnp.float32)
    for k in range(9):
        di, dj = k // 3, k % 3
        tap = slabs[(di % 2, dj % 2, dj // 2)][di // 2:di // 2 + THo]
        acc = acc + tap * w_taps[k]
    acc = jnp.maximum(acc + db_ref[...].reshape(1, 1, Cin), 0.0)

    y = jnp.dot(acc.reshape(THo * Wo, Cin).astype(mxu_dtype),
                pw_ref[...], preferred_element_type=jnp.float32)
    y = jnp.maximum(y + pb_ref[...].reshape(1, Cout), 0.0)
    out_ref[0] = y.reshape(THo, Wo, Cout).astype(out_ref.dtype)


def downsample_dsconv(x_nhwc, p, *, row_tile=None, mac_dtype=None):
    """DepthwiseSeparableConv(kernel=3, stride=2, padding=1, ReLU) via Pallas."""
    N, H, W, C = x_nhwc.shape
    cdt = x_nhwc.dtype
    if mac_dtype is None:
        mac_dtype = _default_mac_dtype(cdt)
    dw, db, pw, pb = p
    Cout = pw.shape[1]
    Ho = (H - 1) // 2 + 1
    Wo = (W - 1) // 2 + 1
    tho = _pick_row_tile(Ho, Wo, max(C, Cout), row_tile)
    n_tiles = pl.cdiv(Ho, tho)
    hop = n_tiles * tho                    # grid-covered output rows

    # Pad (1 top/left; enough zero rows/cols so every phase is (hop+1, Wo+1))
    # and split into the four stride-2 phases so the kernel only issues
    # contiguous, statically shaped reads.  The extra zeros sit exactly where
    # the conv's own zero padding (or the masked ragged tail) would be.
    xp = jnp.pad(x_nhwc,
                 ((0, 0), (1, 2 * hop + 1 - H), (1, 2 * Wo + 1 - W), (0, 0)))
    phases = [xp[:, a::2, b::2, :] for a in (0, 1) for b in (0, 1)]

    vmem_limit, _ = _vmem_defaults()
    phase_spec = pl.BlockSpec((1, hop + 1, Wo + 1, C), lambda n, r: (n, 0, 0, 0))
    in_specs = [phase_spec] * 4 + [
        pl.BlockSpec((9, C), lambda n, r: (0, 0)),
        pl.BlockSpec((1, C), lambda n, r: (0, 0)),
        pl.BlockSpec((C, Cout), lambda n, r: (0, 0)),
        pl.BlockSpec((1, Cout), lambda n, r: (0, 0)),
    ]
    kernel = functools.partial(_dsconv_stride2_kernel, mac_dtype=mac_dtype)
    return pl.pallas_call(
        kernel,
        out_shape=jax.ShapeDtypeStruct((N, Ho, Wo, Cout), cdt),
        grid=(N, n_tiles),
        in_specs=in_specs,
        out_specs=pl.BlockSpec((1, tho, Wo, Cout), lambda n, r: (n, r, 0, 0)),
        compiler_params=pltpu.CompilerParams(
            dimension_semantics=("parallel", "arbitrary"),
            vmem_limit_bytes=vmem_limit),
    )(*phases,
      dw.astype(jnp.float32), db.reshape(1, C).astype(jnp.float32),
      pw.astype(cdt), pb.reshape(1, Cout).astype(jnp.float32))


# ---------------------------------------------------------------------------
# Module: _G1EncoderBlock
# ---------------------------------------------------------------------------
def init_dsconv_params(key, cin, cout, scale=0.2):
    k1, k2, k3, k4 = jax.random.split(key, 4)
    dw_w = jax.random.normal(k1, (9, cin), jnp.float32) * scale   # (kh*kw, Cin)
    dw_b = jax.random.normal(k2, (cin,), jnp.float32) * scale
    pw_w = jax.random.normal(k3, (cin, cout), jnp.float32) * scale
    pw_b = jax.random.normal(k4, (cout,), jnp.float32) * scale
    return (dw_w, dw_b, pw_w, pw_b)


def init_g1_encoder_block_params(key, in_channels, out_channels, is_last_block):
    k1, k2, k3 = jax.random.split(key, 3)
    params = {
        "res1": init_dsconv_params(k1, in_channels, in_channels),
        "res2": init_dsconv_params(k2, in_channels, in_channels),
    }
    if not is_last_block:
        params["conv"] = init_dsconv_params(k3, in_channels, out_channels)
    return params


def g1_encoder_block_nhwc(x_nhwc, params, *, is_last_block,
                          row_tile=None, mac_dtype=None):
    """NHWC core — use this directly when stacking encoder blocks to avoid
    per-block NCHW<->NHWC transposes and dtype casts."""
    xr = fused_res_block(x_nhwc, params["res1"], params["res2"],
                         row_tile=row_tile, mac_dtype=mac_dtype)
    if not is_last_block:
        y = downsample_dsconv(xr, params["conv"],
                              row_tile=row_tile, mac_dtype=mac_dtype)
    else:
        y = xr
    return xr, y


def g1_encoder_block(x_nchw, params, *, is_last_block,
                     dtype=jnp.bfloat16, row_tile=None):
    """Matches _G1EncoderBlock.forward: x = res(x); return (x, conv(x) or x).

    `dtype` = activation-storage / MXU-operand dtype (bf16 default); all
    accumulation is f32; depthwise MAC dtype is generation-gated.
    """
    in_dtype = x_nchw.dtype
    x = jnp.transpose(x_nchw, (0, 2, 3, 1)).astype(dtype)          # NCHW -> NHWC
    xr, y = g1_encoder_block_nhwc(x, params, is_last_block=is_last_block,
                                  row_tile=row_tile)
    to_nchw = lambda t: jnp.transpose(t, (0, 3, 1, 2)).astype(in_dtype)
    return to_nchw(xr), to_nchw(y)


# ---------------------------------------------------------------------------
# Plain-JAX reference (for in-script verification)
# ---------------------------------------------------------------------------
def _dsconv_ref(x, params, stride, residual=None):
    dw_w, dw_b, pw_w, pw_b = params
    C = dw_w.shape[1]
    wd = dw_w.reshape(3, 3, 1, C)
    y = lax.conv_general_dilated(x, wd, (stride, stride), ((1, 1), (1, 1)),
                                 dimension_numbers=("NHWC", "HWIO", "NHWC"),
                                 feature_group_count=C)
    y = jax.nn.relu(y + dw_b)
    wp = pw_w.reshape(1, 1, pw_w.shape[0], pw_w.shape[1])
    y = lax.conv_general_dilated(y, wp, (1, 1), ((0, 0), (0, 0)),
                                 dimension_numbers=("NHWC", "HWIO", "NHWC"))
    y = jax.nn.relu(y + pw_b)
    if residual is not None:
        y = y + residual
    return y


def _g1_ref(x_nchw, params, *, is_last_block):
    x = jnp.transpose(x_nchw, (0, 2, 3, 1))
    h = _dsconv_ref(x, params["res1"], 1)
    xr = _dsconv_ref(h, params["res2"], 1, residual=x)
    y = xr if is_last_block else _dsconv_ref(xr, params["conv"], 2)
    return jnp.transpose(xr, (0, 3, 1, 2)), jnp.transpose(y, (0, 3, 1, 2))


# ---------------------------------------------------------------------------
if __name__ == "__main__":
    key = jax.random.PRNGKey(0)
    kx, kp = jax.random.split(key)

    N, Cin, H, W = 2, 4, 16, 16
    Cout = 8
    is_last_block = False  # exercise the stride-2 downsample path too

    x = jax.random.normal(kx, (N, Cin, H, W), jnp.float32)
    params = init_g1_encoder_block_params(kp, Cin, Cout, is_last_block)

    xr_ref, y_ref = _g1_ref(x, params, is_last_block=is_last_block)

    # 1) f32 path with a small explicit row tile -> exercises the multi-tile
    #    grid (4 row tiles for the ResBlock, 2 for the downsample).
    f32_fwd = jax.jit(functools.partial(g1_encoder_block,
                                        is_last_block=is_last_block,
                                        dtype=jnp.float32, row_tile=4))
    xr, y = f32_fwd(x, params)
    jax.block_until_ready((xr, y))
    assert xr.shape == (N, Cin, H, W), xr.shape
    assert y.shape == (N, Cout, H // 2, W // 2), y.shape
    assert jnp.allclose(xr, xr_ref, atol=5e-4, rtol=5e-4)
    assert jnp.allclose(y, y_ref, atol=5e-4, rtol=5e-4)

    # 2) default performance path: bf16 storage / MXU operands, auto tiling,
    #    generation-gated bf16 depthwise MACs.
    bf16_fwd = jax.jit(functools.partial(g1_encoder_block,
                                         is_last_block=is_last_block))
    xr16, y16 = bf16_fwd(x, params)
    jax.block_until_ready((xr16, y16))
    assert xr16.shape == (N, Cin, H, W)
    assert y16.shape == (N, Cout, H // 2, W // 2)
    assert jnp.allclose(xr16, xr_ref, atol=1e-1, rtol=1e-1)
    assert jnp.allclose(y16, y_ref, atol=1e-1, rtol=1e-1)

    print("KERNEL_OK")
</pallas_src>

<mosaic_0001>
module attributes {stable_mosaic.version = 11 : i64} {
  func.func @_fused_resblock_kernel(%arg0: i32, %arg1: i32, %arg2: memref<1x20x20x4xf32, #tpu.memory_space<vmem>>, %arg3: memref<9x4xf32, #tpu.memory_space<vmem>>, %arg4: memref<1x4xf32, #tpu.memory_space<vmem>>, %arg5: memref<4x4xf32, #tpu.memory_space<vmem>>, %arg6: memref<1x4xf32, #tpu.memory_space<vmem>>, %arg7: memref<9x4xf32, #tpu.memory_space<vmem>>, %arg8: memref<1x4xf32, #tpu.memory_space<vmem>>, %arg9: memref<4x4xf32, #tpu.memory_space<vmem>>, %arg10: memref<1x4xf32, #tpu.memory_space<vmem>>, %arg11: memref<1x4x16x4xf32, #tpu.memory_space<vmem>>) attributes {dimension_semantics = [#tpu.dimension_semantics<parallel>, #tpu.dimension_semantics<arbitrary>], iteration_bounds = array<i64: 2, 4>, scalar_prefetch = 0 : i64, scratch_operands = 0 : i64, tpu.core_type = #tpu.core_type<tc>, window_params = [{transform_indices = @transform_0, window_bounds = array<i64: 1, 20, 20, 4>}, {pipeline_mode = #tpu.pipeline_mode<synchronous>, transform_indices = @transform_1, window_bounds = array<i64: 9, 4>}, {pipeline_mode = #tpu.pipeline_mode<synchronous>, transform_indices = @transform_2, window_bounds = array<i64: 1, 4>}, {pipeline_mode = #tpu.pipeline_mode<synchronous>, transform_indices = @transform_3, window_bounds = array<i64: 4, 4>}, {pipeline_mode = #tpu.pipeline_mode<synchronous>, transform_indices = @transform_4, window_bounds = array<i64: 1, 4>}, {pipeline_mode = #tpu.pipeline_mode<synchronous>, transform_indices = @transform_5, window_bounds = array<i64: 9, 4>}, {pipeline_mode = #tpu.pipeline_mode<synchronous>, transform_indices = @transform_6, window_bounds = array<i64: 1, 4>}, {pipeline_mode = #tpu.pipeline_mode<synchronous>, transform_indices = @transform_7, window_bounds = array<i64: 4, 4>}, {pipeline_mode = #tpu.pipeline_mode<synchronous>, transform_indices = @transform_8, window_bounds = array<i64: 1, 4>}, {transform_indices = @transform_9, window_bounds = array<i64: 1, 4, 16, 4>}]} {
    %c4_i32 = arith.constant 4 : i32
    %0 = arith.muli %arg1, %c4_i32 : i32
    %1 = tpu.assume_multiple %0, 4 : i32
    %c0 = arith.constant 0 : index
    %c0_0 = arith.constant 0 : index
    %2 = vector.load %arg3[%c0, %c0_0] : memref<9x4xf32, #tpu.memory_space<vmem>>, vector<9x4xf32>
    %c0_1 = arith.constant 0 : index
    %c0_2 = arith.constant 0 : index
    %3 = vector.load %arg7[%c0_1, %c0_2] : memref<9x4xf32, #tpu.memory_space<vmem>>, vector<9x4xf32>
    %4 = vector.extract_strided_slice %2 {offsets = [0, 0], sizes = [1, 4], strides = [1, 1]} : vector<9x4xf32> to vector<1x4xf32>
    %5 = vector.shape_cast %4 : vector<1x4xf32> to vector<4xf32>
    %6 = vector.shape_cast %5 : vector<4xf32> to vector<1x1x4xf32>
    %7 = vector.extract_strided_slice %2 {offsets = [1, 0], sizes = [1, 4], strides = [1, 1]} : vector<9x4xf32> to vector<1x4xf32>
    %8 = vector.shape_cast %7 : vector<1x4xf32> to vector<4xf32>
    %9 = vector.shape_cast %8 : vector<4xf32> to vector<1x1x4xf32>
    %10 = vector.extract_strided_slice %2 {offsets = [2, 0], sizes = [1, 4], strides = [1, 1]} : vector<9x4xf32> to vector<1x4xf32>
    %11 = vector.shape_cast %10 : vector<1x4xf32> to vector<4xf32>
    %12 = vector.shape_cast %11 : vector<4xf32> to vector<1x1x4xf32>
    %13 = vector.extract_strided_slice %2 {offsets = [3, 0], sizes = [1, 4], strides = [1, 1]} : vector<9x4xf32> to vector<1x4xf32>
    %14 = vector.shape_cast %13 : vector<1x4xf32> to vector<4xf32>
    %15 = vector.shape_cast %14 : vector<4xf32> to vector<1x1x4xf32>
    %16 = vector.extract_strided_slice %2 {offsets = [4, 0], sizes = [1, 4], strides = [1, 1]} : vector<9x4xf32> to vector<1x4xf32>
    %17 = vector.shape_cast %16 : vector<1x4xf32> to vector<4xf32>
    %18 = vector.shape_cast %17 : vector<4xf32> to vector<1x1x4xf32>
    %19 = vector.extract_strided_slice %2 {offsets = [5, 0], sizes = [1, 4], strides = [1, 1]} : vector<9x4xf32> to vector<1x4xf32>
    %20 = vector.shape_cast %19 : vector<1x4xf32> to vector<4xf32>
    %21 = vector.shape_cast %20 : vector<4xf32> to vector<1x1x4xf32>
    %22 = vector.extract_strided_slice %2 {offsets = [6, 0], sizes = [1, 4], strides = [1, 1]} : vector<9x4xf32> to vector<1x4xf32>
    %23 = vector.shape_cast %22 : vector<1x4xf32> to vector<4xf32>
    %24 = vector.shape_cast %23 : vector<4xf32> to vector<1x1x4xf32>
    %25 = vector.extract_strided_slice %2 {offsets = [7, 0], sizes = [1, 4], strides = [1, 1]} : vector<9x4xf32> to vector<1x4xf32>
    %26 = vector.shape_cast %25 : vector<1x4xf32> to vector<4xf32>
    %27 = vector.shape_cast %26 : vector<4xf32> to vector<1x1x4xf32>
    %28 = vector.extract_strided_slice %2 {offsets = [8, 0], sizes = [1, 4], strides = [1, 1]} : vector<9x4xf32> to vector<1x4xf32>
    %29 = vector.shape_cast %28 : vector<1x4xf32> to vector<4xf32>
    %30 = vector.shape_cast %29 : vector<4xf32> to vector<1x1x4xf32>
    %31 = vector.extract_strided_slice %3 {offsets = [0, 0], sizes = [1, 4], strides = [1, 1]} : vector<9x4xf32> to vector<1x4xf32>
    %32 = vector.shape_cast %31 : vector<1x4xf32> to vector<4xf32>
    %33 = vector.shape_cast %32 : vector<4xf32> to vector<1x1x4xf32>
    %34 = vector.extract_strided_slice %3 {offsets = [1, 0], sizes = [1, 4], strides = [1, 1]} : vector<9x4xf32> to vector<1x4xf32>
    %35 = vector.shape_cast %34 : vector<1x4xf32> to vector<4xf32>
    %36 = vector.shape_cast %35 : vector<4xf32> to vector<1x1x4xf32>
    %37 = vector.extract_strided_slice %3 {offsets = [2, 0], sizes = [1, 4], strides = [1, 1]} : vector<9x4xf32> to vector<1x4xf32>
    %38 = vector.shape_cast %37 : vector<1x4xf32> to vector<4xf32>
    %39 = vector.shape_cast %38 : vector<4xf32> to vector<1x1x4xf32>
    %40 = vector.extract_strided_slice %3 {offsets = [3, 0], sizes = [1, 4], strides = [1, 1]} : vector<9x4xf32> to vector<1x4xf32>
    %41 = vector.shape_cast %40 : vector<1x4xf32> to vector<4xf32>
    %42 = vector.shape_cast %41 : vector<4xf32> to vector<1x1x4xf32>
    %43 = vector.extract_strided_slice %3 {offsets = [4, 0], sizes = [1, 4], strides = [1, 1]} : vector<9x4xf32> to vector<1x4xf32>
    %44 = vector.shape_cast %43 : vector<1x4xf32> to vector<4xf32>
    %45 = vector.shape_cast %44 : vector<4xf32> to vector<1x1x4xf32>
    %46 = vector.extract_strided_slice %3 {offsets = [5, 0], sizes = [1, 4], strides = [1, 1]} : vector<9x4xf32> to vector<1x4xf32>
    %47 = vector.shape_cast %46 : vector<1x4xf32> to vector<4xf32>
    %48 = vector.shape_cast %47 : vector<4xf32> to vector<1x1x4xf32>
    %49 = vector.extract_strided_slice %3 {offsets = [6, 0], sizes = [1, 4], strides = [1, 1]} : vector<9x4xf32> to vector<1x4xf32>
    %50 = vector.shape_cast %49 : vector<1x4xf32> to vector<4xf32>
    %51 = vector.shape_cast %50 : vector<4xf32> to vector<1x1x4xf32>
    %52 = vector.extract_strided_slice %3 {offsets = [7, 0], sizes = [1, 4], strides = [1, 1]} : vector<9x4xf32> to vector<1x4xf32>
    %53 = vector.shape_cast %52 : vector<1x4xf32> to vector<4xf32>
    %54 = vector.shape_cast %53 : vector<4xf32> to vector<1x1x4xf32>
    %55 = vector.extract_strided_slice %3 {offsets = [8, 0], sizes = [1, 4], strides = [1, 1]} : vector<9x4xf32> to vector<1x4xf32>
    %56 = vector.shape_cast %55 : vector<1x4xf32> to vector<4xf32>
    %57 = vector.shape_cast %56 : vector<4xf32> to vector<1x1x4xf32>
    %c0_3 = arith.constant 0 : index
    %58 = arith.index_cast %1 : i32 to index
    %c0_4 = arith.constant 0 : index
    %c0_5 = arith.constant 0 : index
    %59 = vector.load %arg2[%c0_3, %58, %c0_4, %c0_5] : memref<1x20x20x4xf32, #tpu.memory_space<vmem>>, vector<1x8x18x4xf32>
    %60 = vector.shape_cast %59 : vector<1x8x18x4xf32> to vector<8x18x4xf32>
    %c0_6 = arith.constant 0 : index
    %61 = arith.index_cast %1 : i32 to index
    %c1 = arith.constant 1 : index
    %c0_7 = arith.constant 0 : index
    %62 = vector.load %arg2[%c0_6, %61, %c1, %c0_7] : memref<1x20x20x4xf32, #tpu.memory_space<vmem>>, vector<1x8x18x4xf32>
    %63 = vector.shape_cast %62 : vector<1x8x18x4xf32> to vector<8x18x4xf32>
    %c0_8 = arith.constant 0 : index
    %64 = arith.index_cast %1 : i32 to index
    %c2 = arith.constant 2 : index
    %c0_9 = arith.constant 0 : index
    %65 = vector.load %arg2[%c0_8, %64, %c2, %c0_9] : memref<1x20x20x4xf32, #tpu.memory_space<vmem>>, vector<1x8x18x4xf32>
    %66 = vector.shape_cast %65 : vector<1x8x18x4xf32> to vector<8x18x4xf32>
    %cst = arith.constant 0.000000e+00 : f32
    %67 = vector.broadcast %cst : f32 to vector<6x18x4xf32>
    %68 = vector.extract_strided_slice %60 {offsets = [0, 0, 0], sizes = [6, 18, 4], strides = [1, 1, 1]} : vector<8x18x4xf32> to vector<6x18x4xf32>
    %69 = vector.broadcast %6 : vector<1x1x4xf32> to vector<6x18x4xf32>
    %70 = arith.mulf %68, %69 : vector<6x18x4xf32>
    %71 = arith.addf %67, %70 : vector<6x18x4xf32>
    %72 = vector.extract_strided_slice %63 {offsets = [0, 0, 0], sizes = [6, 18, 4], strides = [1, 1, 1]} : vector<8x18x4xf32> to vector<6x18x4xf32>
    %73 = vector.broadcast %9 : vector<1x1x4xf32> to vector<6x18x4xf32>
    %74 = arith.mulf %72, %73 : vector<6x18x4xf32>
    %75 = arith.addf %71, %74 : vector<6x18x4xf32>
    %76 = vector.extract_strided_slice %66 {offsets = [0, 0, 0], sizes = [6, 18, 4], strides = [1, 1, 1]} : vector<8x18x4xf32> to vector<6x18x4xf32>
    %77 = vector.broadcast %12 : vector<1x1x4xf32> to vector<6x18x4xf32>
    %78 = arith.mulf %76, %77 : vector<6x18x4xf32>
    %79 = arith.addf %75, %78 : vector<6x18x4xf32>
    %80 = vector.extract_strided_slice %60 {offsets = [1, 0, 0], sizes = [6, 18, 4], strides = [1, 1, 1]} : vector<8x18x4xf32> to vector<6x18x4xf32>
    %81 = vector.broadcast %15 : vector<1x1x4xf32> to vector<6x18x4xf32>
    %82 = arith.mulf %80, %81 : vector<6x18x4xf32>
    %83 = arith.addf %79, %82 : vector<6x18x4xf32>
    %84 = vector.extract_strided_slice %63 {offsets = [1, 0, 0], sizes = [6, 18, 4], strides = [1, 1, 1]} : vector<8x18x4xf32> to vector<6x18x4xf32>
    %85 = vector.broadcast %18 : vector<1x1x4xf32> to vector<6x18x4xf32>
    %86 = arith.mulf %84, %85 : vector<6x18x4xf32>
    %87 = arith.addf %83, %86 : vector<6x18x4xf32>
    %88 = vector.extract_strided_slice %66 {offsets = [1, 0, 0], sizes = [6, 18, 4], strides = [1, 1, 1]} : vector<8x18x4xf32> to vector<6x18x4xf32>
    %89 = vector.broadcast %21 : vector<1x1x4xf32> to vector<6x18x4xf32>
    %90 = arith.mulf %88, %89 : vector<6x18x4xf32>
    %91 = arith.addf %87, %90 : vector<6x18x4xf32>
    %92 = vector.extract_strided_slice %60 {offsets = [2, 0, 0], sizes = [6, 18, 4], strides = [1, 1, 1]} : vector<8x18x4xf32> to vector<6x18x4xf32>
    %93 = vector.broadcast %24 : vector<1x1x4xf32> to vector<6x18x4xf32>
    %94 = arith.mulf %92, %93 : vector<6x18x4xf32>
    %95 = arith.addf %91, %94 : vector<6x18x4xf32>
    %96 = vector.extract_strided_slice %63 {offsets = [2, 0, 0], sizes = [6, 18, 4], strides = [1, 1, 1]} : vector<8x18x4xf32> to vector<6x18x4xf32>
    %97 = vector.broadcast %27 : vector<1x1x4xf32> to vector<6x18x4xf32>
    %98 = arith.mulf %96, %97 : vector<6x18x4xf32>
    %99 = arith.addf %95, %98 : vector<6x18x4xf32>
    %100 = vector.extract_strided_slice %66 {offsets = [2, 0, 0], sizes = [6, 18, 4], strides = [1, 1, 1]} : vector<8x18x4xf32> to vector<6x18x4xf32>
    %101 = vector.broadcast %30 : vector<1x1x4xf32> to vector<6x18x4xf32>
    %102 = arith.mulf %100, %101 : vector<6x18x4xf32>
    %103 = arith.addf %99, %102 : vector<6x18x4xf32>
    %c0_10 = arith.constant 0 : index
    %c0_11 = arith.constant 0 : index
    %104 = vector.load %arg4[%c0_10, %c0_11] : memref<1x4xf32, #tpu.memory_space<vmem>>, vector<1x4xf32>
    %105 = vector.shape_cast %104 : vector<1x4xf32> to vector<1x1x4xf32>
    %106 = vector.broadcast %105 : vector<1x1x4xf32> to vector<6x18x4xf32>
    %107 = arith.addf %103, %106 : vector<6x18x4xf32>
    %cst_12 = arith.constant 0.000000e+00 : f32
    %108 = vector.broadcast %cst_12 : f32 to vector<6x18x4xf32>
    %109 = arith.maximumf %107, %108 : vector<6x18x4xf32>
    %110 = vector.shape_cast %109 : vector<6x18x4xf32> to vector<108x4xf32>
    %c0_13 = arith.constant 0 : index
    %c0_14 = arith.constant 0 : index
    %111 = vector.load %arg5[%c0_13, %c0_14] : memref<4x4xf32, #tpu.memory_space<vmem>>, vector<4x4xf32>
    %cst_15 = arith.constant dense<0.000000e+00> : vector<108x4xf32>
    %112 = tpu.matmul %110, %111, %cst_15 {dimension_numbers = #tpu.dot_dimension_numbers<[1], [0], [0], [1], [0, 0, 1, 1], [], []>} : vector<108x4xf32>, vector<4x4xf32>, vector<108x4xf32> -> vector<108x4xf32>
    %c0_16 = arith.constant 0 : index
    %c0_17 = arith.constant 0 : index
    %113 = vector.load %arg6[%c0_16, %c0_17] : memref<1x4xf32, #tpu.memory_space<vmem>>, vector<1x4xf32>
    %114 = vector.broadcast %113 : vector<1x4xf32> to vector<108x4xf32>
    %115 = arith.addf %112, %114 : vector<108x4xf32>
    %cst_18 = arith.constant 0.000000e+00 : f32
    %116 = vector.broadcast %cst_18 : f32 to vector<108x4xf32>
    %117 = arith.maximumf %115, %116 : vector<108x4xf32>
    %118 = vector.shape_cast %117 : vector<108x4xf32> to vector<6x18x4xf32>
    %119 = tpu.iota {dimensions = array<i32: 0>} : vector<6x1x1xi32>
    %c1_i32 = arith.constant 1 : i32
    %120 = arith.subi %1, %c1_i32 : i32
    %121 = vector.broadcast %120 : i32 to vector<6x1x1xi32>
    %122 = arith.addi %119, %121 : vector<6x1x1xi32>
    %123 = tpu.iota {dimensions = array<i32: 1>} : vector<1x18x1xi32>
    %c1_i32_19 = arith.constant 1 : i32
    %124 = vector.broadcast %c1_i32_19 : i32 to vector<1x18x1xi32>
    %125 = arith.subi %123, %124 : vector<1x18x1xi32>
    %c0_i32 = arith.constant 0 : i32
    %126 = vector.broadcast %c0_i32 : i32 to vector<6x1x1xi32>
    %127 = arith.cmpi sge, %122, %126 : vector<6x1x1xi32>
    %c16_i32 = arith.constant 16 : i32
    %128 = vector.broadcast %c16_i32 : i32 to vector<6x1x1xi32>
    %129 = arith.cmpi slt, %122, %128 : vector<6x1x1xi32>
    %130 = arith.andi %127, %129 : vector<6x1x1xi1>
    %c0_i32_20 = arith.constant 0 : i32
    %131 = vector.broadcast %c0_i32_20 : i32 to vector<1x18x1xi32>
    %132 = arith.cmpi sge, %125, %131 : vector<1x18x1xi32>
    %133 = vector.broadcast %130 : vector<6x1x1xi1> to vector<6x18x1xi1>
    %134 = vector.broadcast %132 : vector<1x18x1xi1> to vector<6x18x1xi1>
    %135 = arith.andi %133, %134 : vector<6x18x1xi1>
    %c16_i32_21 = arith.constant 16 : i32
    %136 = vector.broadcast %c16_i32_21 : i32 to vector<1x18x1xi32>
    %137 = arith.cmpi slt, %125, %136 : vector<1x18x1xi32>
    %138 = vector.broadcast %137 : vector<1x18x1xi1> to vector<6x18x1xi1>
    %139 = arith.andi %135, %138 : vector<6x18x1xi1>
    %cst_22 = arith.constant 0.000000e+00 : f32
    %140 = vector.shape_cast %139 : vector<6x18x1xi1> to vector<6x18x1xi1>
    %141 = vector.broadcast %140 : vector<6x18x1xi1> to vector<6x18x4xi1>
    %142 = vector.broadcast %cst_22 : f32 to vector<6x18x4xf32>
    %143 = arith.select %141, %118, %142 : vector<6x18x4xi1>, vector<6x18x4xf32>
    %144 = vector.extract_strided_slice %143 {offsets = [0, 0, 0], sizes = [6, 16, 4], strides = [1, 1, 1]} : vector<6x18x4xf32> to vector<6x16x4xf32>
    %145 = vector.extract_strided_slice %143 {offsets = [0, 1, 0], sizes = [6, 16, 4], strides = [1, 1, 1]} : vector<6x18x4xf32> to vector<6x16x4xf32>
    %146 = vector.extract_strided_slice %143 {offsets = [0, 2, 0], sizes = [6, 16, 4], strides = [1, 1, 1]} : vector<6x18x4xf32> to vector<6x16x4xf32>
    %cst_23 = arith.constant 0.000000e+00 : f32
    %147 = vector.broadcast %cst_23 : f32 to vector<4x16x4xf32>
    %148 = vector.extract_strided_slice %144 {offsets = [0, 0, 0], sizes = [4, 16, 4], strides = [1, 1, 1]} : vector<6x16x4xf32> to vector<4x16x4xf32>
    %149 = vector.broadcast %33 : vector<1x1x4xf32> to vector<4x16x4xf32>
    %150 = arith.mulf %148, %149 : vector<4x16x4xf32>
    %151 = arith.addf %147, %150 : vector<4x16x4xf32>
    %152 = vector.extract_strided_slice %145 {offsets = [0, 0, 0], sizes = [4, 16, 4], strides = [1, 1, 1]} : vector<6x16x4xf32> to vector<4x16x4xf32>
    %153 = vector.broadcast %36 : vector<1x1x4xf32> to vector<4x16x4xf32>
    %154 = arith.mulf %152, %153 : vector<4x16x4xf32>
    %155 = arith.addf %151, %154 : vector<4x16x4xf32>
    %156 = vector.extract_strided_slice %146 {offsets = [0, 0, 0], sizes = [4, 16, 4], strides = [1, 1, 1]} : vector<6x16x4xf32> to vector<4x16x4xf32>
    %157 = vector.broadcast %39 : vector<1x1x4xf32> to vector<4x16x4xf32>
    %158 = arith.mulf %156, %157 : vector<4x16x4xf32>
    %159 = arith.addf %155, %158 : vector<4x16x4xf32>
    %160 = vector.extract_strided_slice %144 {offsets = [1, 0, 0], sizes = [4, 16, 4], strides = [1, 1, 1]} : vector<6x16x4xf32> to vector<4x16x4xf32>
    %161 = vector.broadcast %42 : vector<1x1x4xf32> to vector<4x16x4xf32>
    %162 = arith.mulf %160, %161 : vector<4x16x4xf32>
    %163 = arith.addf %159, %162 : vector<4x16x4xf32>
    %164 = vector.extract_strided_slice %145 {offsets = [1, 0, 0], sizes = [4, 16, 4], strides = [1, 1, 1]} : vector<6x16x4xf32> to vector<4x16x4xf32>
    %165 = vector.broadcast %45 : vector<1x1x4xf32> to vector<4x16x4xf32>
    %166 = arith.mulf %164, %165 : vector<4x16x4xf32>
    %167 = arith.addf %163, %166 : vector<4x16x4xf32>
    %168 = vector.extract_strided_slice %146 {offsets = [1, 0, 0], sizes = [4, 16, 4], strides = [1, 1, 1]} : vector<6x16x4xf32> to vector<4x16x4xf32>
    %169 = vector.broadcast %48 : vector<1x1x4xf32> to vector<4x16x4xf32>
    %170 = arith.mulf %168, %169 : vector<4x16x4xf32>
    %171 = arith.addf %167, %170 : vector<4x16x4xf32>
    %172 = vector.extract_strided_slice %144 {offsets = [2, 0, 0], sizes = [4, 16, 4], strides = [1, 1, 1]} : vector<6x16x4xf32> to vector<4x16x4xf32>
    %173 = vector.broadcast %51 : vector<1x1x4xf32> to vector<4x16x4xf32>
    %174 = arith.mulf %172, %173 : vector<4x16x4xf32>
    %175 = arith.addf %171, %174 : vector<4x16x4xf32>
    %176 = vector.extract_strided_slice %145 {offsets = [2, 0, 0], sizes = [4, 16, 4], strides = [1, 1, 1]} : vector<6x16x4xf32> to vector<4x16x4xf32>
    %177 = vector.broadcast %54 : vector<1x1x4xf32> to vector<4x16x4xf32>
    %178 = arith.mulf %176, %177 : vector<4x16x4xf32>
    %179 = arith.addf %175, %178 : vector<4x16x4xf32>
    %180 = vector.extract_strided_slice %146 {offsets = [2, 0, 0], sizes = [4, 16, 4], strides = [1, 1, 1]} : vector<6x16x4xf32> to vector<4x16x4xf32>
    %181 = vector.broadcast %57 : vector<1x1x4xf32> to vector<4x16x4xf32>
    %182 = arith.mulf %180, %181 : vector<4x16x4xf32>
    %183 = arith.addf %179, %182 : vector<4x16x4xf32>
    %c0_24 = arith.constant 0 : index
    %c0_25 = arith.constant 0 : index
    %184 = vector.load %arg8[%c0_24, %c0_25] : memref<1x4xf32, #tpu.memory_space<vmem>>, vector<1x4xf32>
    %185 = vector.shape_cast %184 : vector<1x4xf32> to vector<1x1x4xf32>
    %186 = vector.broadcast %185 : vector<1x1x4xf32> to vector<4x16x4xf32>
    %187 = arith.addf %183, %186 : vector<4x16x4xf32>
    %cst_26 = arith.constant 0.000000e+00 : f32
    %188 = vector.broadcast %cst_26 : f32 to vector<4x16x4xf32>
    %189 = arith.maximumf %187, %188 : vector<4x16x4xf32>
    %190 = vector.shape_cast %189 : vector<4x16x4xf32> to vector<64x4xf32>
    %c0_27 = arith.constant 0 : index
    %c0_28 = arith.constant 0 : index
    %191 = vector.load %arg9[%c0_27, %c0_28] : memref<4x4xf32, #tpu.memory_space<vmem>>, vector<4x4xf32>
    %cst_29 = arith.constant dense<0.000000e+00> : vector<64x4xf32>
    %192 = tpu.matmul %190, %191, %cst_29 {dimension_numbers = #tpu.dot_dimension_numbers<[1], [0], [0], [1], [0, 0, 1, 1], [], []>} : vector<64x4xf32>, vector<4x4xf32>, vector<64x4xf32> -> vector<64x4xf32>
    %c0_30 = arith.constant 0 : index
    %c0_31 = arith.constant 0 : index
    %193 = vector.load %arg10[%c0_30, %c0_31] : memref<1x4xf32, #tpu.memory_space<vmem>>, vector<1x4xf32>
    %194 = vector.broadcast %193 : vector<1x4xf32> to vector<64x4xf32>
    %195 = arith.addf %192, %194 : vector<64x4xf32>
    %cst_32 = arith.constant 0.000000e+00 : f32
    %196 = vector.broadcast %cst_32 : f32 to vector<64x4xf32>
    %197 = arith.maximumf %195, %196 : vector<64x4xf32>
    %198 = vector.shape_cast %197 : vector<64x4xf32> to vector<4x16x4xf32>
    %199 = vector.extract_strided_slice %66 {offsets = [2, 0, 0], sizes = [4, 16, 4], strides = [1, 1, 1]} : vector<8x18x4xf32> to vector<4x16x4xf32>
    %200 = arith.addf %198, %199 : vector<4x16x4xf32>
    %c0_33 = arith.constant 0 : index
    %c0_34 = arith.constant 0 : index
    %c0_35 = arith.constant 0 : index
    %c0_36 = arith.constant 0 : index
    %201 = vector.load %arg11[%c0_33, %c0_34, %c0_35, %c0_36] : memref<1x4x16x4xf32, #tpu.memory_space<vmem>>, vector<1x4x16x4xf32>
    %202 = vector.shape_cast %201 : vector<1x4x16x4xf32> to vector<4x16x4xf32>
    %203 = vector.shape_cast %200 : vector<4x16x4xf32> to vector<1x4x16x4xf32>
    tpu.vector_store %arg11[%c0_33, %c0_34, %c0_35, %c0_36], %203 {strides = array<i32>} : memref<1x4x16x4xf32, #tpu.memory_space<vmem>>, vector<1x4x16x4xf32>,
    return
  }
  func.func @transform_0(%arg0: i32, %arg1: i32) -> (i32, i32, i32, i32) {
    %c0_i32 = arith.constant 0 : i32
    %c0_i32_0 = arith.constant 0 : i32
    %c0_i32_1 = arith.constant 0 : i32
    %c0_i32_2 = arith.constant 0 : i32
    return %arg0, %c0_i32, %c0_i32_0, %c0_i32_1 : i32, i32, i32, i32
  }
  func.func @transform_1(%arg0: i32, %arg1: i32) -> (i32, i32) {
    %c0_i32 = arith.constant 0 : i32
    %c0_i32_0 = arith.constant 0 : i32
    %c0_i32_1 = arith.constant 0 : i32
    return %c0_i32, %c0_i32_0 : i32, i32
  }
  func.func @transform_2(%arg0: i32, %arg1: i32) -> (i32, i32) {
    %c0_i32 = arith.constant 0 : i32
    %c0_i32_0 = arith.constant 0 : i32
    %c0_i32_1 = arith.constant 0 : i32
    return %c0_i32, %c0_i32_0 : i32, i32
  }
  func.func @transform_3(%arg0: i32, %arg1: i32) -> (i32, i32) {
    %c0_i32 = arith.constant 0 : i32
    %c0_i32_0 = arith.constant 0 : i32
    %c0_i32_1 = arith.constant 0 : i32
    return %c0_i32, %c0_i32_0 : i32, i32
  }
  func.func @transform_4(%arg0: i32, %arg1: i32) -> (i32, i32) {
    %c0_i32 = arith.constant 0 : i32
    %c0_i32_0 = arith.constant 0 : i32
    %c0_i32_1 = arith.constant 0 : i32
    return %c0_i32, %c0_i32_0 : i32, i32
  }
  func.func @transform_5(%arg0: i32, %arg1: i32) -> (i32, i32) {
    %c0_i32 = arith.constant 0 : i32
    %c0_i32_0 = arith.constant 0 : i32
    %c0_i32_1 = arith.constant 0 : i32
    return %c0_i32, %c0_i32_0 : i32, i32
  }
  func.func @transform_6(%arg0: i32, %arg1: i32) -> (i32, i32) {
    %c0_i32 = arith.constant 0 : i32
    %c0_i32_0 = arith.constant 0 : i32
    %c0_i32_1 = arith.constant 0 : i32
    return %c0_i32, %c0_i32_0 : i32, i32
  }
  func.func @transform_7(%arg0: i32, %arg1: i32) -> (i32, i32) {
    %c0_i32 = arith.constant 0 : i32
    %c0_i32_0 = arith.constant 0 : i32
    %c0_i32_1 = arith.constant 0 : i32
    return %c0_i32, %c0_i32_0 : i32, i32
  }
  func.func @transform_8(%arg0: i32, %arg1: i32) -> (i32, i32) {
    %c0_i32 = arith.constant 0 : i32
    %c0_i32_0 = arith.constant 0 : i32
    %c0_i32_1 = arith.constant 0 : i32
    return %c0_i32, %c0_i32_0 : i32, i32
  }
  func.func @transform_9(%arg0: i32, %arg1: i32) -> (i32, i32, i32, i32) {
    %c0_i32 = arith.constant 0 : i32
    %c0_i32_0 = arith.constant 0 : i32
    %c0_i32_1 = arith.constant 0 : i32
    return %arg0, %arg1, %c0_i32, %c0_i32_0 : i32, i32, i32, i32
  }
}

module attributes {stable_mosaic.version = 11 : i64} {
  func.func @_dsconv_stride2_kernel(%arg0: i32, %arg1: i32, %arg2: memref<1x9x9x4xf32, #tpu.memory_space<vmem>>, %arg3: memref<1x9x9x4xf32, #tpu.memory_space<vmem>>, %arg4: memref<1x9x9x4xf32, #tpu.memory_space<vmem>>, %arg5: memref<1x9x9x4xf32, #tpu.memory_space<vmem>>, %arg6: memref<9x4xf32, #tpu.memory_space<vmem>>, %arg7: memref<1x4xf32, #tpu.memory_space<vmem>>, %arg8: memref<4x8xf32, #tpu.memory_space<vmem>>, %arg9: memref<1x8xf32, #tpu.memory_space<vmem>>, %arg10: memref<1x4x8x8xf32, #tpu.memory_space<vmem>>) attributes {dimension_semantics = [#tpu.dimension_semantics<parallel>, #tpu.dimension_semantics<arbitrary>], iteration_bounds = array<i64: 2, 2>, scalar_prefetch = 0 : i64, scratch_operands = 0 : i64, tpu.core_type = #tpu.core_type<tc>, window_params = [{transform_indices = @transform_0, window_bounds = array<i64: 1, 9, 9, 4>}, {transform_indices = @transform_1, window_bounds = array<i64: 1, 9, 9, 4>}, {transform_indices = @transform_2, window_bounds = array<i64: 1, 9, 9, 4>}, {transform_indices = @transform_3, window_bounds = array<i64: 1, 9, 9, 4>}, {pipeline_mode = #tpu.pipeline_mode<synchronous>, transform_indices = @transform_4, window_bounds = array<i64: 9, 4>}, {pipeline_mode = #tpu.pipeline_mode<synchronous>, transform_indices = @transform_5, window_bounds = array<i64: 1, 4>}, {pipeline_mode = #tpu.pipeline_mode<synchronous>, transform_indices = @transform_6, window_bounds = array<i64: 4, 8>}, {pipeline_mode = #tpu.pipeline_mode<synchronous>, transform_indices = @transform_7, window_bounds = array<i64: 1, 8>}, {transform_indices = @transform_8, window_bounds = array<i64: 1, 4, 8, 8>}]} {
    %c4_i32 = arith.constant 4 : i32
    %0 = arith.muli %arg1, %c4_i32 : i32
    %1 = tpu.assume_multiple %0, 4 : i32
    %c0 = arith.constant 0 : index
    %c0_0 = arith.constant 0 : index
    %2 = vector.load %arg6[%c0, %c0_0] : memref<9x4xf32, #tpu.memory_space<vmem>>, vector<9x4xf32>
    %3 = vector.extract_strided_slice %2 {offsets = [0, 0], sizes = [1, 4], strides = [1, 1]} : vector<9x4xf32> to vector<1x4xf32>
    %4 = vector.shape_cast %3 : vector<1x4xf32> to vector<4xf32>
    %5 = vector.shape_cast %4 : vector<4xf32> to vector<1x1x4xf32>
    %6 = vector.extract_strided_slice %2 {offsets = [1, 0], sizes = [1, 4], strides = [1, 1]} : vector<9x4xf32> to vector<1x4xf32>
    %7 = vector.shape_cast %6 : vector<1x4xf32> to vector<4xf32>
    %8 = vector.shape_cast %7 : vector<4xf32> to vector<1x1x4xf32>
    %9 = vector.extract_strided_slice %2 {offsets = [2, 0], sizes = [1, 4], strides = [1, 1]} : vector<9x4xf32> to vector<1x4xf32>
    %10 = vector.shape_cast %9 : vector<1x4xf32> to vector<4xf32>
    %11 = vector.shape_cast %10 : vector<4xf32> to vector<1x1x4xf32>
    %12 = vector.extract_strided_slice %2 {offsets = [3, 0], sizes = [1, 4], strides = [1, 1]} : vector<9x4xf32> to vector<1x4xf32>
    %13 = vector.shape_cast %12 : vector<1x4xf32> to vector<4xf32>
    %14 = vector.shape_cast %13 : vector<4xf32> to vector<1x1x4xf32>
    %15 = vector.extract_strided_slice %2 {offsets = [4, 0], sizes = [1, 4], strides = [1, 1]} : vector<9x4xf32> to vector<1x4xf32>
    %16 = vector.shape_cast %15 : vector<1x4xf32> to vector<4xf32>
    %17 = vector.shape_cast %16 : vector<4xf32> to vector<1x1x4xf32>
    %18 = vector.extract_strided_slice %2 {offsets = [5, 0], sizes = [1, 4], strides = [1, 1]} : vector<9x4xf32> to vector<1x4xf32>
    %19 = vector.shape_cast %18 : vector<1x4xf32> to vector<4xf32>
    %20 = vector.shape_cast %19 : vector<4xf32> to vector<1x1x4xf32>
    %21 = vector.extract_strided_slice %2 {offsets = [6, 0], sizes = [1, 4], strides = [1, 1]} : vector<9x4xf32> to vector<1x4xf32>
    %22 = vector.shape_cast %21 : vector<1x4xf32> to vector<4xf32>
    %23 = vector.shape_cast %22 : vector<4xf32> to vector<1x1x4xf32>
    %24 = vector.extract_strided_slice %2 {offsets = [7, 0], sizes = [1, 4], strides = [1, 1]} : vector<9x4xf32> to vector<1x4xf32>
    %25 = vector.shape_cast %24 : vector<1x4xf32> to vector<4xf32>
    %26 = vector.shape_cast %25 : vector<4xf32> to vector<1x1x4xf32>
    %27 = vector.extract_strided_slice %2 {offsets = [8, 0], sizes = [1, 4], strides = [1, 1]} : vector<9x4xf32> to vector<1x4xf32>
    %28 = vector.shape_cast %27 : vector<1x4xf32> to vector<4xf32>
    %29 = vector.shape_cast %28 : vector<4xf32> to vector<1x1x4xf32>
    %c0_1 = arith.constant 0 : index
    %30 = arith.index_cast %1 : i32 to index
    %c0_2 = arith.constant 0 : index
    %c0_3 = arith.constant 0 : index
    %31 = vector.load %arg2[%c0_1, %30, %c0_2, %c0_3] : memref<1x9x9x4xf32, #tpu.memory_space<vmem>>, vector<1x5x8x4xf32>
    %32 = vector.shape_cast %31 : vector<1x5x8x4xf32> to vector<5x8x4xf32>
    %c0_4 = arith.constant 0 : index
    %33 = arith.index_cast %1 : i32 to index
    %c1 = arith.constant 1 : index
    %c0_5 = arith.constant 0 : index
    %34 = vector.load %arg2[%c0_4, %33, %c1, %c0_5] : memref<1x9x9x4xf32, #tpu.memory_space<vmem>>, vector<1x5x8x4xf32>
    %35 = vector.shape_cast %34 : vector<1x5x8x4xf32> to vector<5x8x4xf32>
    %c0_6 = arith.constant 0 : index
    %36 = arith.index_cast %1 : i32 to index
    %c0_7 = arith.constant 0 : index
    %c0_8 = arith.constant 0 : index
    %37 = vector.load %arg3[%c0_6, %36, %c0_7, %c0_8] : memref<1x9x9x4xf32, #tpu.memory_space<vmem>>, vector<1x5x8x4xf32>
    %38 = vector.shape_cast %37 : vector<1x5x8x4xf32> to vector<5x8x4xf32>
    %c0_9 = arith.constant 0 : index
    %39 = arith.index_cast %1 : i32 to index
    %c0_10 = arith.constant 0 : index
    %c0_11 = arith.constant 0 : index
    %40 = vector.load %arg4[%c0_9, %39, %c0_10, %c0_11] : memref<1x9x9x4xf32, #tpu.memory_space<vmem>>, vector<1x5x8x4xf32>
    %41 = vector.shape_cast %40 : vector<1x5x8x4xf32> to vector<5x8x4xf32>
    %c0_12 = arith.constant 0 : index
    %42 = arith.index_cast %1 : i32 to index
    %c1_13 = arith.constant 1 : index
    %c0_14 = arith.constant 0 : index
    %43 = vector.load %arg4[%c0_12, %42, %c1_13, %c0_14] : memref<1x9x9x4xf32, #tpu.memory_space<vmem>>, vector<1x5x8x4xf32>
    %44 = vector.shape_cast %43 : vector<1x5x8x4xf32> to vector<5x8x4xf32>
    %c0_15 = arith.constant 0 : index
    %45 = arith.index_cast %1 : i32 to index
    %c0_16 = arith.constant 0 : index
    %c0_17 = arith.constant 0 : index
    %46 = vector.load %arg5[%c0_15, %45, %c0_16, %c0_17] : memref<1x9x9x4xf32, #tpu.memory_space<vmem>>, vector<1x5x8x4xf32>
    %47 = vector.shape_cast %46 : vector<1x5x8x4xf32> to vector<5x8x4xf32>
    %cst = arith.constant 0.000000e+00 : f32
    %48 = vector.broadcast %cst : f32 to vector<4x8x4xf32>
    %49 = vector.extract_strided_slice %32 {offsets = [0, 0, 0], sizes = [4, 8, 4], strides = [1, 1, 1]} : vector<5x8x4xf32> to vector<4x8x4xf32>
    %50 = vector.broadcast %5 : vector<1x1x4xf32> to vector<4x8x4xf32>
    %51 = arith.mulf %49, %50 : vector<4x8x4xf32>
    %52 = arith.addf %48, %51 : vector<4x8x4xf32>
    %53 = vector.extract_strided_slice %38 {offsets = [0, 0, 0], sizes = [4, 8, 4], strides = [1, 1, 1]} : vector<5x8x4xf32> to vector<4x8x4xf32>
    %54 = vector.broadcast %8 : vector<1x1x4xf32> to vector<4x8x4xf32>
    %55 = arith.mulf %53, %54 : vector<4x8x4xf32>
    %56 = arith.addf %52, %55 : vector<4x8x4xf32>
    %57 = vector.extract_strided_slice %35 {offsets = [0, 0, 0], sizes = [4, 8, 4], strides = [1, 1, 1]} : vector<5x8x4xf32> to vector<4x8x4xf32>
    %58 = vector.broadcast %11 : vector<1x1x4xf32> to vector<4x8x4xf32>
    %59 = arith.mulf %57, %58 : vector<4x8x4xf32>
    %60 = arith.addf %56, %59 : vector<4x8x4xf32>
    %61 = vector.extract_strided_slice %41 {offsets = [0, 0, 0], sizes = [4, 8, 4], strides = [1, 1, 1]} : vector<5x8x4xf32> to vector<4x8x4xf32>
    %62 = vector.broadcast %14 : vector<1x1x4xf32> to vector<4x8x4xf32>
    %63 = arith.mulf %61, %62 : vector<4x8x4xf32>
    %64 = arith.addf %60, %63 : vector<4x8x4xf32>
    %65 = vector.extract_strided_slice %47 {offsets = [0, 0, 0], sizes = [4, 8, 4], strides = [1, 1, 1]} : vector<5x8x4xf32> to vector<4x8x4xf32>
    %66 = vector.broadcast %17 : vector<1x1x4xf32> to vector<4x8x4xf32>
    %67 = arith.mulf %65, %66 : vector<4x8x4xf32>
    %68 = arith.addf %64, %67 : vector<4x8x4xf32>
    %69 = vector.extract_strided_slice %44 {offsets = [0, 0, 0], sizes = [4, 8, 4], strides = [1, 1, 1]} : vector<5x8x4xf32> to vector<4x8x4xf32>
    %70 = vector.broadcast %20 : vector<1x1x4xf32> to vector<4x8x4xf32>
    %71 = arith.mulf %69, %70 : vector<4x8x4xf32>
    %72 = arith.addf %68, %71 : vector<4x8x4xf32>
    %73 = vector.extract_strided_slice %32 {offsets = [1, 0, 0], sizes = [4, 8, 4], strides = [1, 1, 1]} : vector<5x8x4xf32> to vector<4x8x4xf32>
    %74 = vector.broadcast %23 : vector<1x1x4xf32> to vector<4x8x4xf32>
    %75 = arith.mulf %73, %74 : vector<4x8x4xf32>
    %76 = arith.addf %72, %75 : vector<4x8x4xf32>
    %77 = vector.extract_strided_slice %38 {offsets = [1, 0, 0], sizes = [4, 8, 4], strides = [1, 1, 1]} : vector<5x8x4xf32> to vector<4x8x4xf32>
    %78 = vector.broadcast %26 : vector<1x1x4xf32> to vector<4x8x4xf32>
    %79 = arith.mulf %77, %78 : vector<4x8x4xf32>
    %80 = arith.addf %76, %79 : vector<4x8x4xf32>
    %81 = vector.extract_strided_slice %35 {offsets = [1, 0, 0], sizes = [4, 8, 4], strides = [1, 1, 1]} : vector<5x8x4xf32> to vector<4x8x4xf32>
    %82 = vector.broadcast %29 : vector<1x1x4xf32> to vector<4x8x4xf32>
    %83 = arith.mulf %81, %82 : vector<4x8x4xf32>
    %84 = arith.addf %80, %83 : vector<4x8x4xf32>
    %c0_18 = arith.constant 0 : index
    %c0_19 = arith.constant 0 : index
    %85 = vector.load %arg7[%c0_18, %c0_19] : memref<1x4xf32, #tpu.memory_space<vmem>>, vector<1x4xf32>
    %86 = vector.shape_cast %85 : vector<1x4xf32> to vector<1x1x4xf32>
    %87 = vector.broadcast %86 : vector<1x1x4xf32> to vector<4x8x4xf32>
    %88 = arith.addf %84, %87 : vector<4x8x4xf32>
    %cst_20 = arith.constant 0.000000e+00 : f32
    %89 = vector.broadcast %cst_20 : f32 to vector<4x8x4xf32>
    %90 = arith.maximumf %88, %89 : vector<4x8x4xf32>
    %91 = vector.shape_cast %90 : vector<4x8x4xf32> to vector<32x4xf32>
    %c0_21 = arith.constant 0 : index
    %c0_22 = arith.constant 0 : index
    %92 = vector.load %arg8[%c0_21, %c0_22] : memref<4x8xf32, #tpu.memory_space<vmem>>, vector<4x8xf32>
    %cst_23 = arith.constant dense<0.000000e+00> : vector<32x8xf32>
    %93 = tpu.matmul %91, %92, %cst_23 {dimension_numbers = #tpu.dot_dimension_numbers<[1], [0], [0], [1], [0, 0, 1, 1], [], []>} : vector<32x4xf32>, vector<4x8xf32>, vector<32x8xf32> -> vector<32x8xf32>
    %c0_24 = arith.constant 0 : index
    %c0_25 = arith.constant 0 : index
    %94 = vector.load %arg9[%c0_24, %c0_25] : memref<1x8xf32, #tpu.memory_space<vmem>>, vector<1x8xf32>
    %95 = vector.broadcast %94 : vector<1x8xf32> to vector<32x8xf32>
    %96 = arith.addf %93, %95 : vector<32x8xf32>
    %cst_26 = arith.constant 0.000000e+00 : f32
    %97 = vector.broadcast %cst_26 : f32 to vector<32x8xf32>
    %98 = arith.maximumf %96, %97 : vector<32x8xf32>
    %99 = vector.shape_cast %98 : vector<32x8xf32> to vector<4x8x8xf32>
    %c0_27 = arith.constant 0 : index
    %c0_28 = arith.constant 0 : index
    %c0_29 = arith.constant 0 : index
    %c0_30 = arith.constant 0 : index
    %100 = vector.load %arg10[%c0_27, %c0_28, %c0_29, %c0_30] : memref<1x4x8x8xf32, #tpu.memory_space<vmem>>, vector<1x4x8x8xf32>
    %101 = vector.shape_cast %100 : vector<1x4x8x8xf32> to vector<4x8x8xf32>
    %102 = vector.shape_cast %99 : vector<4x8x8xf32> to vector<1x4x8x8xf32>
    tpu.vector_store %arg10[%c0_27, %c0_28, %c0_29, %c0_30], %102 {strides = array<i32>} : memref<1x4x8x8xf32, #tpu.memory_space<vmem>>, vector<1x4x8x8xf32>,
    return
  }
  func.func @transform_0(%arg0: i32, %arg1: i32) -> (i32, i32, i32, i32) {
    %c0_i32 = arith.constant 0 : i32
    %c0_i32_0 = arith.constant 0 : i32
    %c0_i32_1 = arith.constant 0 : i32
    %c0_i32_2 = arith.constant 0 : i32
    return %arg0, %c0_i32, %c0_i32_0, %c0_i32_1 : i32, i32, i32, i32
  }
  func.func @transform_1(%arg0: i32, %arg1: i32) -> (i32, i32, i32, i32) {
    %c0_i32 = arith.constant 0 : i32
    %c0_i32_0 = arith.constant 0 : i32
    %c0_i32_1 = arith.constant 0 : i32
    %c0_i32_2 = arith.constant 0 : i32
    return %arg0, %c0_i32, %c0_i32_0, %c0_i32_1 : i32, i32, i32, i32
  }
  func.func @transform_2(%arg0: i32, %arg1: i32) -> (i32, i32, i32, i32) {
    %c0_i32 = arith.constant 0 : i32
    %c0_i32_0 = arith.constant 0 : i32
    %c0_i32_1 = arith.constant 0 : i32
    %c0_i32_2 = arith.constant 0 : i32
    return %arg0, %c0_i32, %c0_i32_0, %c0_i32_1 : i32, i32, i32, i32
  }
  func.func @transform_3(%arg0: i32, %arg1: i32) -> (i32, i32, i32, i32) {
    %c0_i32 = arith.constant 0 : i32
    %c0_i32_0 = arith.constant 0 : i32
    %c0_i32_1 = arith.constant 0 : i32
    %c0_i32_2 = arith.constant 0 : i32
    return %arg0, %c0_i32, %c0_i32_0, %c0_i32_1 : i32, i32, i32, i32
  }
  func.func @transform_4(%arg0: i32, %arg1: i32) -> (i32, i32) {
    %c0_i32 = arith.constant 0 : i32
    %c0_i32_0 = arith.constant 0 : i32
    %c0_i32_1 = arith.constant 0 : i32
    return %c0_i32, %c0_i32_0 : i32, i32
  }
  func.func @transform_5(%arg0: i32, %arg1: i32) -> (i32, i32) {
    %c0_i32 = arith.constant 0 : i32
    %c0_i32_0 = arith.constant 0 : i32
    %c0_i32_1 = arith.constant 0 : i32
    return %c0_i32, %c0_i32_0 : i32, i32
  }
  func.func @transform_6(%arg0: i32, %arg1: i32) -> (i32, i32) {
    %c0_i32 = arith.constant 0 : i32
    %c0_i32_0 = arith.constant 0 : i32
    %c0_i32_1 = arith.constant 0 : i32
    return %c0_i32, %c0_i32_0 : i32, i32
  }
  func.func @transform_7(%arg0: i32, %arg1: i32) -> (i32, i32) {
    %c0_i32 = arith.constant 0 : i32
    %c0_i32_0 = arith.constant 0 : i32
    %c0_i32_1 = arith.constant 0 : i32
    return %c0_i32, %c0_i32_0 : i32, i32
  }
  func.func @transform_8(%arg0: i32, %arg1: i32) -> (i32, i32, i32, i32) {
    %c0_i32 = arith.constant 0 : i32
    %c0_i32_0 = arith.constant 0 : i32
    %c0_i32_1 = arith.constant 0 : i32
    return %arg0, %arg1, %c0_i32, %c0_i32_0 : i32, i32, i32, i32
  }
}

</mosaic_0001>

<bundles_post_ra>
// kernel: g1_encoder_block.3
= control target key start
LH: loop header
LB: loop body
LE: loop exit
PB: predicated region body
PF: predicated region fallthrough
CT: control target
= control target key end

     0   :  { %s960_s27 = smov 0   ;;  %s962_s28 = smov 0   ;;  %s1102_s0 = inlined_call_operand.vmem [shape: f32[2,9,9,4], index: 0, kind: input, shape index: {}]   ;;  %s1103_s1 = inlined_call_operand.vmem [shape: f32[2,9,9,4], index: 1, kind: input, shape index: {}]   ;;  %s1104_s2 = inlined_call_operand.vmem [shape: f32[2,9,9,4], index: 2, kind: input, shape index: {}]   ;;  %s1105_s3 = inlined_call_operand.vmem [shape: f32[2,9,9,4], index: 3, kind: input, shape index: {}]   ;;  %s1106_s4 = inlined_call_operand.vmem [shape: f32[9,4], index: 4, kind: input, shape index: {}]   ;;  %s1107_s5 = inlined_call_operand.vmem [shape: f32[1,4], index: 5, kind: input, shape index: {}]   ;;  %s1108_s6 = inlined_call_operand.vmem [shape: f32[4,8], index: 6, kind: input, shape index: {}]   ;;  %s1109_s7 = inlined_call_operand.vmem [shape: f32[1,8], index: 7, kind: input, shape index: {}]   ;;  %s1110_s8 = inlined_call_operand.vmem [shape: f32[2,8,8,8], index: 8, kind: output, shape index: {}]  }
   0x1   :  { %s964_s29 = smov 0   ;;  %s966_s30 = smov 0  }
   0x2   :  { %s968_s9 = smov 0  }
   0x3 LB: > { %s27_s10 = sadd.s32 1, %s905_s29  ;;  %s30_s11 = sadd.s32 1, %s909_s30  ;;  %s913_s9 = sphi %s968_s9, %s18_s9   ;;  %s909_s30 = sphi %s966_s30, %s1114_s30   ;;  %s905_s29 = sphi %s964_s29, %s1113_s29   ;;  %s901_s28 = sphi %s962_s28, %s1112_s28   ;;  %s897_s27 = sphi %s960_s27, %s1111_s27  }
   0x4   : > { %p28_p0 = scmp.ge.s32.totalorder %s27_s10, 2  ;;  %p798_p1 = scmp.ge.s32.totalorder %s913_s9, 1 }
   0x5   : > { %p306_p2 = scmp.lt.s32.totalorder %s913_s9, 5 }
   0x6   : > { %s1116_s10 = smov (%p28_p0, %s27_s10), 0  ;;  %s1118_s11 = smov (!%p28_p0, %s30_s11), %s909_s30 }
   0x7   : > { %p307_p3 = pnand %p798_p1, %p306_p2  ;;  %p32_p4 = scmp.ge.s32.totalorder %s1118_s11, 2 }
   0x8   : > { %p359_p5 = scmp.lt.s32.totalorder (!%p307_p3), %s901_s28, 1  ;;  %s818_s17 = sshll.u32 (!%p307_p3), %s897_s27, 6 }
   0x9   : > { %s1120_s11 = smov (%p32_p4, %s1118_s11), 0  ;;  %310 = sbr.rel (%p307_p3) target bundleno = 252 (0xfc), region = 52 }
   0xe   : > { %v547_v0 = vld [vmem:[%s1108_s6] sm:$0xf]  ;;  %vm568_vm0 = vcmask 1043456   ;;  %v424_v1 = vlaneseq  ;;  %s1122_s28 = smov (!%p359_p5, %s901_s28), 1  ;;  %vm555_vm1 = vcmask 31744   ;;  %vm661_vm2 = vcmask 64512  }
   0xf   : > { %824 = vmatprep.subr.msk.mxu0 %vm568_vm0, %v547_v0  ;;  %832 = vmatprep.subr.msk.mxu1 %vm568_vm0, %v547_v0  ;;  %v1002_v3 = vld [vmem:[%s1106_s4] sm:$0xff]  ;;  %s834_s16 = smul.u32 144, %s1122_s28  ;;  %s804_s24 = sshll.u32 %s1122_s28, 3 }
  0x10   : > { %825 = vmatpush3.msk.msra.mxu0 %vm568_vm0, %v547_v0  ;;  %833 = vmatpush3.msk.msra.mxu1 %vm568_vm0, %v547_v0  ;;  %v997_v2 = vshrl.u32 %v424_v1, 7 }
  0x11   : > { %s363_s20 = scalar_lea.vmem %s1102_s0, %s834_s16  ;;  %s368_s23 = scalar_lea.vmem %s1103_s1, %s834_s16 }
  0x12   : > { %v426_v4 = vsub.s32 0, %v997_v2  ;;  %v438_v5 = vsub.s32 1, %v997_v2  ;;  %v450_v6 = vsub.s32 2, %v997_v2  ;;  %v462_v7 = vsub.s32 3, %v997_v2  ;;  %s373_s26 = scalar_lea.vmem %s1104_s2, %s834_s16  ;;  %s378_s14 = scalar_lea.vmem %s1105_s3, %s834_s16 }
  0x13   : > { %v474_v8 = vsub.s32 4, %v997_v2  ;;  %s1026_s15 = scalar_lea.vmem %s363_s20, %s818_s17  ;;  %s1028_s18 = scalar_lea.vmem %s368_s23, %s818_s17  ;;  %v486_v13 = vsub.s32 5, %v997_v2  ;;  %v498_v14 = vsub.s32 6, %v997_v2  ;;  %v510_v24 = vsub.s32 7, %v997_v2 }
  0x14   : > { %v427_v9 = vrot.slane %v1002_v3, %v426_v4  ;;  %v439_v10 = vrot.slane %v1002_v3, %v438_v5  ;;  %v451_v11 = vrot.slane %v1002_v3, %v450_v6  ;;  %v463_v12 = vrot.slane %v1002_v3, %v462_v7  ;;  %v394_v15 = vld [vmem:[%s1026_s15] sm:$0xff]  ;;  %v395_v16 = vld [vmem:[%s1026_s15 + $0x10] sm:$0xff]  ;;  %s1036_s16 = scalar_lea.vmem %s373_s26, %s818_s17  ;;  %s1038_s19 = scalar_lea.vmem %s378_s14, %s818_s17 }
  0x15   : > { %v399_v17 = vld [vmem:[%s1026_s15 + $0x1] sm:$0xff]  ;;  %v475_v18 = vrot.slane %v1002_v3, %v474_v8  ;;  %v1042_v19 = vld [vmem:[%s1026_s15 + $0x11] sm:$0xff]  ;;  %v487_v36 = vrot.slane %v1002_v3, %v486_v13  ;;  %v499_v37 = vrot.slane %v1002_v3, %v498_v14  ;;  %v511_v60 = vrot.slane %v1002_v3, %v510_v24  ;;  %s803_s23 = sshll.u32 %s897_s27, 2 }
  0x16   : > { %v405_v20 = vld [vmem:[%s1028_s18] sm:$0xff]  ;;  %v406_v21 = vld [vmem:[%s1028_s18 + $0x10] sm:$0xff]  ;;  %v428_v22 = vmul.f32 %v427_v9, %v394_v15  ;;  %v429_v23 = vmul.f32 %v427_v9, %v395_v16  ;;  %v452_v30 = vmul.f32 %v451_v11, %v399_v17  ;;  %v453_v31 = vmul.f32 %v451_v11, %v1042_v19  ;;  %p382_p6 = scmp.lt.s32.totalorder %s803_s23, 7 }
  0x17   : > { %v411_v25 = vld [vmem:[%s1036_s16] sm:$0xff]  ;;  %v412_v26 = vld [vmem:[%s1036_s16 + $0x10] sm:$0xff]  ;;  %v440_v28 = vmul.f32 %v439_v10, %v405_v20  ;;  %v441_v29 = vmul.f32 %v439_v10, %v406_v21  ;;  %v500_v7 = vmul.f32 %v499_v37, %v395_v16  ;;  %v512_v15 = vmul.f32 %v511_v60, %v406_v21 }
  0x18   : > { %v415_v27 = vld [vmem:[%s1036_s16 + $0x1] sm:$0xff]  ;;  %v421_v33 = vld [vmem:[%s1038_s19 + $0x10] sm:$0xff]  ;;  %v464_v34 = vmul.f32 %v463_v12, %v411_v25  ;;  %v465_v35 = vmul.f32 %v463_v12, %v412_v26  ;;  %s1124_s23 = smov (!%p382_p6, %s803_s23), 7 }
  0x19   : > { %v420_v32 = vld [vmem:[%s1038_s19] sm:$0xff]  ;;  %v444_v39 = vadd.f32 %v440_v28, %v428_v22  ;;  %v445_v40 = vadd.f32 %v441_v29, %v429_v23  ;;  %v477_v42 = vmul.f32 %v475_v18, %v421_v33  ;;  %v397_v43 = vld [vmem:[%s1026_s15 + $0x30] sm:$0xff]  ;;  %v488_v59 = vmul.f32 %v487_v36, %v415_v27  ;;  %s385_s25 = sadd.s32 %s804_s24, %s1124_s23 }
  0x1a   : > { %v396_v38 = vld [vmem:[%s1026_s15 + $0x20] sm:$0xff]  ;;  %v476_v41 = vmul.f32 %v475_v18, %v420_v32  ;;  %v402_v45 = vld [vmem:[%s1026_s15 + $0x31] sm:$0xff]  ;;  %v431_v50 = vmul.f32 %v427_v9, %v397_v43  ;;  %v502_v27 = vmul.f32 %v499_v37, %v397_v43  ;;  %s805_s13 = sshll.u32 %s385_s25, 3 }
  0x1b   : > { %v401_v44 = vld [vmem:[%s1026_s15 + $0x21] sm:$0xff]  ;;  %v408_v47 = vld [vmem:[%s1028_s18 + $0x30] sm:$0xff]  ;;  %v430_v49 = vmul.f32 %v427_v9, %v396_v38  ;;  %v455_v52 = vmul.f32 %v451_v11, %v402_v45  ;;  %v456_v53 = vadd.f32 %v452_v30, %v444_v39  ;;  %v457_v54 = vadd.f32 %v453_v31, %v445_v40 }
  0x1c   : > { %v407_v46 = vld [vmem:[%s1028_s18 + $0x20] sm:$0xff]  ;;  %v454_v51 = vmul.f32 %v451_v11, %v401_v44  ;;  %v414_v55 = vld [vmem:[%s1036_s16 + $0x30] sm:$0xff]  ;;  %v443_v58 = vmul.f32 %v439_v10, %v408_v47  ;;  %v501_v22 = vmul.f32 %v499_v37, %v396_v38  ;;  %v514_v21 = vmul.f32 %v511_v60, %v408_v47 }
  0x1d   : > { %v413_v48 = vld [vmem:[%s1036_s16 + $0x20] sm:$0xff]  ;;  %v442_v57 = vmul.f32 %v439_v10, %v407_v46  ;;  %v423_v61 = vld [vmem:[%s1038_s19 + $0x30] sm:$0xff]  ;;  %v467_v63 = vmul.f32 %v463_v12, %v414_v55  ;;  %v468_v0 = vadd.f32 %v464_v34, %v456_v53  ;;  %v469_v1 = vadd.f32 %v465_v35, %v457_v54  ;;  %v808_v10 = vld [vmem:[%s1106_s4 + $0x8] ss:$0 sm:$0xff] }
  0x1e   : > { %v422_v56 = vld [vmem:[%s1038_s19 + $0x20] sm:$0xff]  ;;  %v466_v62 = vmul.f32 %v463_v12, %v413_v48  ;;  %v447_v5 = vadd.f32 %v443_v58, %v431_v50  ;;  %v416_v6 = vld [vmem:[%s1036_s16 + $0x11] sm:$0xff]  ;;  %v479_v9 = vmul.f32 %v475_v18, %v423_v61  ;;  %v524_v26 = vmul.f32 %v808_v10, %v1042_v19 }
  0x1f   : > { %v417_v2 = vld [vmem:[%s1036_s16 + $0x21] sm:$0xff]  ;;  %v446_v4 = vadd.f32 %v442_v57, %v430_v49  ;;  %v478_v8 = vmul.f32 %v475_v18, %v422_v56  ;;  %v418_v11 = vld [vmem:[%s1036_s16 + $0x31] sm:$0xff]  ;;  %v480_v13 = vadd.f32 %v476_v41, %v468_v0  ;;  %v481_v3 = vadd.f32 %v477_v42, %v469_v1  ;;  %v809_v19 = vld [vmem:[%s1107_s5] ss:$0 sm:$0xff] }
  0x20   : > { %v459_v12 = vadd.f32 %v455_v52, %v447_v5  ;;  %v490_v17 = vmul.f32 %v487_v36, %v417_v2  ;;  %v489_v20 = vmul.f32 %v487_v36, %v416_v6  ;;  %v398_v23 = vld [vmem:[%s1026_s15 + $0x40] sm:$0xff]  ;;  %v491_v18 = vmul.f32 %v487_v36, %v418_v11 }
  0x21   : > { %v458_v14 = vadd.f32 %v454_v51, %v446_v4  ;;  %v492_v24 = vadd.f32 %v488_v59, %v480_v13  ;;  %v513_v29 = vmul.f32 %v511_v60, %v407_v46  ;;  %v409_v30 = vld [vmem:[%s1028_s18 + $0x40] sm:$0xff]  ;;  %v503_v34 = vmul.f32 %v499_v37, %v398_v23  ;;  %s387_s18 = scalar_lea.vmem %s1110_s8, %s805_s13 }
  0x22   : > { %v471_v25 = vadd.f32 %v467_v63, %v459_v12  ;;  %v493_v28 = vadd.f32 %v489_v20, %v481_v3  ;;  %v525_v39 = vmul.f32 %v808_v10, %v401_v44  ;;  %v403_v38 = vld [vmem:[%s1026_s15 + $0x41] sm:$0xff]  ;;  %v515_v48 = vmul.f32 %v511_v60, %v409_v30  ;;  %v810_v61 = vld [vmem:[%s1109_s7] ss:$0 sm:$0xff] }
  0x23   : > { %v470_v16 = vadd.f32 %v466_v62, %v458_v14  ;;  %v504_v31 = vadd.f32 %v500_v7, %v492_v24  ;;  %v526_v36 = vmul.f32 %v808_v10, %v402_v45  ;;  %v527_v51 = vmul.f32 %v808_v10, %v403_v38 }
  0x24   : > { %v483_v33 = vadd.f32 %v479_v9, %v471_v25  ;;  %v505_v35 = vadd.f32 %v501_v22, %v493_v28 }
  0x25   : > { %v482_v32 = vadd.f32 %v478_v8, %v470_v16  ;;  %v516_v40 = vadd.f32 %v512_v15, %v504_v31 }
  0x26   : > { %v495_v42 = vadd.f32 %v491_v18, %v483_v33  ;;  %v517_v43 = vadd.f32 %v513_v29, %v505_v35 }
  0x27   : > { %v494_v41 = vadd.f32 %v490_v17, %v482_v32  ;;  %v528_v46 = vadd.f32 %v524_v26, %v516_v40 }
  0x28   : > { %v507_v50 = vadd.f32 %v503_v34, %v495_v42  ;;  %v529_v52 = vadd.f32 %v525_v39, %v517_v43 }
  0x29   : > { %v506_v49 = vadd.f32 %v502_v27, %v494_v41  ;;  %v539_v37 = vadd.f32 %v809_v19, %v528_v46 }
  0x2a   : > { %v519_v44 = vadd.f32 %v515_v48, %v507_v50  ;;  %v540_v53 = vadd.f32 %v809_v19, %v529_v52 }
  0x2b   : > { %v518_v47 = vadd.f32 %v514_v21, %v506_v49  ;;  %v543_v54 = vmax.f32 %v539_v37, 0.0 }
  0x2c   : > { %v531_v56 = vadd.f32 %v527_v51, %v519_v44  ;;  %v544_v57 = vmax.f32 %v540_v53, 0.0 }
  0x2d   : > { %v530_v55 = vadd.f32 %v526_v36, %v518_v47  ;;  %826 = vmatprep.mubr.msk.f32.mxu0 %vm555_vm1, %v543_v54 }
  0x2e   : > { %v542_v45 = vadd.f32 %v809_v19, %v531_v56  ;;  %827 = vmatmul.mubr.msk.f32.vlgmr.msra.gmra.mxu0 %vm555_vm1, %v544_v57 }
  0x2f   : > { %v541_v58 = vadd.f32 %v809_v19, %v530_v55 }
  0x30   : > { %v546_v60 = vmax.f32 %v542_v45, 0.0 }
  0x31   : > { %v545_v59 = vmax.f32 %v541_v58, 0.0 }
  0x33   : > { %829 = vmatprep.mubr.msk.f32.mxu1 %vm555_vm1, %v545_v59 }
  0x34   : > { %830 = vmatmul.mubr.msk.f32.vlgmr.msra.gmra.mxu1 %vm555_vm1, %v546_v60 }
  0xee   : > { %v828_v62 = vpop.f32.mrf.mxu0 }
  0xef   : > { %v644_v63 = vadd.f32 %v828_v62, %v810_v61 }
  0xf0   : > { %v638_v0 = vpop.f32.mrf.mxu0 }
  0xf1   : > { %v658_v1 = vmax.f32 %v644_v63, 0.0  ;;  %v639_v2 = vadd.f32 %v810_v61, %v638_v0 }
  0xf3   : > { %663 = vst.msk [vmem:[%s387_s18 + $0x8] sm:$0xff] %vm661_vm2, %v658_v1  ;;  %v657_v6 = vmax.f32 %v639_v2, 0.0 }
  0xf4   : > { %v831_v4 = vpop.f32.mrf.mxu1 }
  0xf5   : > { %v654_v5 = vadd.f32 %v831_v4, %v810_v61  ;;  %662 = vst.msk [vmem:[%s387_s18] sm:$0xff] %vm661_vm2, %v657_v6 }
  0xf6   : > { %v648_v7 = vpop.f32.mrf.mxu1 }
  0xf7   : > { %v660_v8 = vmax.f32 %v654_v5, 0.0  ;;  %v649_v9 = vadd.f32 %v810_v61, %v648_v7 }
  0xf9   : > { %665 = vst.msk [vmem:[%s387_s18 + $0x18] sm:$0xff] %vm661_vm2, %v660_v8  ;;  %v659_v11 = vmax.f32 %v649_v9, 0.0 }
  0xfb   : > { %664 = vst.msk [vmem:[%s387_s18 + $0x10] sm:$0xff] %vm661_vm2, %v659_v11 }
  0xfc PF: > { %s18_s9 = sadd.s32 1, %s913_s9   ;;  %s1111_s27 = smov %s905_s29 }
  0xfd   : > { %p15_p7 = scmp.ge.s32.totalorder %s18_s9, 6   ;;  %s1112_s28 = smov %s909_s30 }
  0xfe   : > { %s1113_s29 = smov %s1116_s10  ;;  %s1114_s30 = smov %s1120_s11 }
  0xff   :  { %17 = sbr.rel (!%p15_p7) target bundleno = 3 (0x3), region = 95 }

// kernel: g1_encoder_block.2
= control target key start
LH: loop header
LB: loop body
LE: loop exit
PB: predicated region body
PF: predicated region fallthrough
CT: control target
= control target key end

     0   :  { %s3159_s30 = smov 0   ;;  %s3161_s10 = smov 0   ;;  %s4530_s0 = inlined_call_operand.vmem [shape: f32[2,20,20,4], index: 0, kind: input, shape index: {}]   ;;  %s4531_s1 = inlined_call_operand.vmem [shape: f32[9,4], index: 1, kind: input, shape index: {}]   ;;  %s4532_s2 = inlined_call_operand.vmem [shape: f32[1,4], index: 2, kind: input, shape index: {}]   ;;  %s4533_s3 = inlined_call_operand.vmem [shape: f32[4,4], index: 3, kind: input, shape index: {}]   ;;  %s4534_s4 = inlined_call_operand.vmem [shape: f32[1,4], index: 4, kind: input, shape index: {}]   ;;  %s4535_s5 = inlined_call_operand.vmem [shape: f32[9,4], index: 5, kind: input, shape index: {}]   ;;  %s4536_s6 = inlined_call_operand.vmem [shape: f32[1,4], index: 6, kind: input, shape index: {}]   ;;  %s4537_s7 = inlined_call_operand.vmem [shape: f32[4,4], index: 7, kind: input, shape index: {}]   ;;  %s4538_s8 = inlined_call_operand.vmem [shape: f32[1,4], index: 8, kind: input, shape index: {}]   ;;  %s4539_s9 = inlined_call_operand.vmem [shape: f32[2,16,16,4], index: 9, kind: output, shape index: {}]  }
   0x1   :  { %s3163_s11 = smov 0   ;;  %s3165_s12 = smov 0  }
   0x2   :  { %s3167_s13 = smov 0  }
   0x3 LB: > { %s28_s14 = sadd.s32 1, %s3098_s11  ;;  %s31_s15 = sadd.s32 1, %s3102_s12  ;;  %s3106_s13 = sphi %s3167_s13, %s19_s13   ;;  %s3102_s12 = sphi %s3165_s12, %s4582_s12   ;;  %s3098_s11 = sphi %s3163_s11, %s4581_s11   ;;  %s3094_s10 = sphi %s3161_s10, %s4580_s10   ;;  %s3090_s30 = sphi %s3159_s30, %s4579_s30  }
   0x4   : > { %p29_p0 = scmp.ge.s32.totalorder %s28_s14, 4  ;;  %p2911_p1 = scmp.ge.s32.totalorder %s3106_s13, 1 }
   0x5   : > { %p301_p2 = scmp.lt.s32.totalorder %s3106_s13, 9 }
   0x6   : > { %s4584_s14 = smov (%p29_p0, %s28_s14), 0  ;;  %s4586_s15 = smov (!%p29_p0, %s31_s15), %s3102_s12 }
   0x7   : > { %p302_p3 = pnand %p2911_p1, %p301_p2  ;;  %p33_p4 = scmp.ge.s32.totalorder %s4586_s15, 2 }
   0x8   : > { %p342_p5 = scmp.lt.s32.totalorder (!%p302_p3), %s3094_s10, 1  ;;  %s2918_s20 = smul.u32 (!%p302_p3), 96, %s3090_s30 }
   0x9   : > { %s4588_s15 = smov (%p33_p4, %s4586_s15), 0  ;;  %305 = sbr.rel (%p302_p3) target bundleno = 612 (0x264), region = 56 }
   0xe   : > { %v1104_v0 = vld [vmem:[%s4533_s3] sm:$0xf]  ;;  %vm1370_vm0 = vcmask 1043456   ;;  %v437_v1 = vlaneseq  ;;  %s4590_s10 = smov (!%p342_p5, %s3094_s10), 1  ;;  %v3108_v4 = vmov 1983009808  }
   0xf   : > { %2979 = vmatprep.subr.msk.mxu0 %vm1370_vm0, %v1104_v0  ;;  %3016 = vmatprep.subr.msk.mxu1 %vm1370_vm0, %v1104_v0  ;;  %v359_v3 = vld [vmem:[%s4531_s1] sm:$0xff]  ;;  %v3206_v5 = vunpack.c.l.s4 %v3108_v4  ;;  %s3018_s21 = smul.u32 480, %s4590_s10  ;;  %v3278_v40 = vld [vmem:[%s4531_s1 + $0x8] ss:$0 sm:$0xff]  ;;  %vm1341_vm1 = vcmask 31744   ;;  %vm2230_vm9 = vcmask 1046528  }
  0x10   : > { %2980 = vmatpush3.msk.msra.mxu0 %vm1370_vm0, %v1104_v0  ;;  %v3199_v2 = vshrl.u32 %v437_v1, 7  ;;  %3017 = vmatpush3.msk.msra.mxu1 %vm1370_vm0, %v1104_v0  ;;  %vm2295_vm11 = vcmask 1045504   ;;  %s2915_s29 = sshll.u32 %s4590_s10, 5 }
  0x11   : > { %s346_s24 = scalar_lea.vmem %s4530_s0, %s3018_s21  ;;  %v861_v25 = vunpack.c.0.s8 %v3206_v5 }
  0x12   : > { %v439_v6 = vsub.s32 0, %v3199_v2  ;;  %v479_v7 = vsub.s32 1, %v3199_v2  ;;  %v4545_v8 = vsub.s32 2, %v3199_v2  ;;  %v4541_v9 = vsub.s32 3, %v3199_v2  ;;  %s3232_s25 = scalar_lea.vmem %s346_s24, %s2918_s20  ;;  %s3819_s20 = sshll.u32 %s3090_s30, 2 }
  0x13   : > { %v4544_v10 = vsub.s32 4, %v3199_v2  ;;  %v4543_v11 = vsub.s32 5, %v3199_v2  ;;  %v4540_v12 = vsub.s32 6, %v3199_v2  ;;  %v4542_v13 = vsub.s32 7, %v3199_v2  ;;  %v365_v19 = vld [vmem:[%s3232_s25] sm:$0xff]  ;;  %v368_v20 = vld [vmem:[%s3232_s25 + $0x18] sm:$0xff] }
  0x14   : > { %v3222_v14 = vrot.slane %v359_v3, %v439_v6  ;;  %v3226_v15 = vrot.slane %v359_v3, %v479_v7  ;;  %v3230_v16 = vrot.slane %v359_v3, %v4541_v9  ;;  %v3236_v17 = vrot.slane %v359_v3, %v4545_v8  ;;  %v371_v21 = vld [vmem:[%s3232_s25 + $0x30] sm:$0xff]  ;;  %v3259_v26 = vld [vmem:[%s3232_s25 + $0x48] sm:$0xff]  ;;  %v392_v28 = vld [vmem:[%s3232_s25 + $0x19] sm:$0xff]  ;;  %s2937_s21 = sadd.s32 4294967295, %s3819_s20  ;;  %p350_p6 = scmp.lt.s32.totalorder %s3819_s20, 15 }
  0x15   : > { %v3240_v18 = vrot.slane %v359_v3, %v4544_v10  ;;  %v3247_v22 = vrot.slane %v359_v3, %v4543_v11  ;;  %v3251_v23 = vrot.slane %v359_v3, %v4540_v12  ;;  %v3255_v24 = vrot.slane %v359_v3, %v4542_v13  ;;  %v389_v27 = vld [vmem:[%s3232_s25 + $0x1] sm:$0xff]  ;;  %v395_v33 = vld [vmem:[%s3232_s25 + $0x31] sm:$0xff]  ;;  %v390_v57 = vld [vmem:[%s3232_s25 + $0x9] sm:$0xff] }
  0x16   : > { %v441_v29 = vmul.f32 %v3222_v14, %v365_v19  ;;  %v444_v30 = vmul.f32 %v3222_v14, %v368_v20  ;;  %v447_v31 = vmul.f32 %v3222_v14, %v371_v21  ;;  %v561_v32 = vmul.f32 %v3230_v16, %v368_v20  ;;  %v413_v34 = vld [vmem:[%s3232_s25 + $0x2] sm:$0xff]  ;;  %v416_v35 = vld [vmem:[%s3232_s25 + $0x1a] sm:$0xff]  ;;  %v419_v41 = vld [vmem:[%s3232_s25 + $0x32] sm:$0xff]  ;;  %s4592_s20 = smov (!%p350_p6, %s3819_s20), 15 }
  0x17   : > { %v481_v36 = vmul.f32 %v3226_v15, %v389_v27  ;;  %v484_v37 = vmul.f32 %v3226_v15, %v392_v28  ;;  %v564_v38 = vmul.f32 %v3230_v16, %v371_v21  ;;  %v567_v39 = vmul.f32 %v3230_v16, %v3259_v26  ;;  %v366_v50 = vld [vmem:[%s3232_s25 + $0x8] sm:$0xff]  ;;  %v369_v55 = vld [vmem:[%s3232_s25 + $0x20] sm:$0xff]  ;;  %v372_v56 = vld [vmem:[%s3232_s25 + $0x38] sm:$0xff]  ;;  %s2914_s28 = sshll.u32 %s4592_s20, 1 }
  0x18   : > { %v487_v42 = vmul.f32 %v3226_v15, %v395_v33  ;;  %v521_v43 = vmul.f32 %v3236_v17, %v413_v34  ;;  %v524_v44 = vmul.f32 %v3236_v17, %v416_v35  ;;  %v601_v45 = vmul.f32 %v3240_v18, %v392_v28  ;;  %v393_v62 = vld [vmem:[%s3232_s25 + $0x21] sm:$0xff]  ;;  %v396_v63 = vld [vmem:[%s3232_s25 + $0x39] sm:$0xff]  ;;  %v414_v0 = vld [vmem:[%s3232_s25 + $0xa] sm:$0xff]  ;;  %s354_s16 = sadd.s32 %s2915_s29, %s2914_s28 }
  0x19   : > { %v499_v46 = vadd.f32 %v481_v36, %v441_v29  ;;  %v502_v47 = vadd.f32 %v484_v37, %v444_v30  ;;  %v527_v48 = vmul.f32 %v3236_v17, %v419_v41  ;;  %v604_v49 = vmul.f32 %v3240_v18, %v395_v33  ;;  %v417_v4 = vld [vmem:[%s3232_s25 + $0x22] sm:$0xff]  ;;  %v3310_v27 = vld [vmem:[%s3232_s25 + $0x3a] sm:$0xff]  ;;  %s2916_s19 = sshll.u32 %s354_s16, 3 }
  0x1a   : > { %v505_v51 = vadd.f32 %v487_v42, %v447_v31  ;;  %v641_v52 = vmul.f32 %v3247_v22, %v416_v35  ;;  %v3290_v53 = vmul.f32 %v3247_v22, %v419_v41  ;;  %v681_v54 = vmul.f32 %v3251_v23, %v371_v21  ;;  %v367_v42 = vld [vmem:[%s3232_s25 + $0x10] sm:$0x3]  ;;  %s4489_s22 = scalar_lea.vmem %s4539_s9, %s2916_s19 }
  0x1b   : > { %v539_v58 = vadd.f32 %v521_v43, %v499_v46  ;;  %v542_v59 = vadd.f32 %v524_v44, %v502_v47  ;;  %v721_v60 = vmul.f32 %v3255_v24, %v395_v33  ;;  %v761_v61 = vmul.f32 %v3278_v40, %v419_v41  ;;  %v370_v43 = vld [vmem:[%s3232_s25 + $0x28] sm:$0x3] }
  0x1c   : > { %v545_v1 = vadd.f32 %v527_v48, %v505_v51  ;;  %v3302_v3 = vsub.s32 %v861_v25, %v3199_v2  ;;  %v442_v5 = vmul.f32 %v3222_v14, %v366_v50  ;;  %v3307_v19 = vmul.f32 %v3222_v14, %v369_v55  ;;  %v373_v48 = vld [vmem:[%s3232_s25 + $0x40] sm:$0x3]  ;;  %v394_v50 = vld [vmem:[%s3232_s25 + $0x29] sm:$0x3] }
  0x1d   : > { %v579_v20 = vadd.f32 %v561_v32, %v539_v58  ;;  %v582_v21 = vadd.f32 %v564_v38, %v542_v59  ;;  %v448_v28 = vmul.f32 %v3222_v14, %v372_v56  ;;  %v482_v29 = vmul.f32 %v3226_v15, %v390_v57  ;;  %v397_v58 = vld [vmem:[%s3232_s25 + $0x41] sm:$0x3]  ;;  %v398_v59 = vld [vmem:[%s3232_s25 + $0x49] sm:$0xff] }
  0x1e   : > { %v3314_v30 = vadd.f32 %v567_v39, %v545_v1  ;;  %v3317_v25 = vmul.f32 %v3226_v15, %v393_v62  ;;  %v488_v31 = vmul.f32 %v3226_v15, %v396_v63  ;;  %v522_v33 = vmul.f32 %v3236_v17, %v414_v0  ;;  %v415_v1 = vld [vmem:[%s3232_s25 + $0x12] sm:$0x3] }
  0x1f   : > { %v619_v32 = vadd.f32 %v601_v45, %v579_v20  ;;  %v622_v34 = vadd.f32 %v604_v49, %v582_v21  ;;  %v500_v35 = vadd.f32 %v482_v29, %v442_v5  ;;  %v3322_v36 = vmul.f32 %v3236_v17, %v417_v4  ;;  %v391_v49 = vld [vmem:[%s3232_s25 + $0x11] sm:$0x3]  ;;  %v418_v5 = vld [vmem:[%s3232_s25 + $0x2a] sm:$0x3]  ;;  %v421_v20 = vld [vmem:[%s3232_s25 + $0x42] sm:$0x3] }
  0x20   : > { %v3324_v37 = vadd.f32 %v488_v31, %v448_v28  ;;  %v3328_v38 = vmul.f32 %v3236_v17, %v3310_v27  ;;  %v562_v39 = vmul.f32 %v3230_v16, %v369_v55  ;;  %v3332_v41 = vmul.f32 %v3230_v16, %v372_v56 }
  0x21   : > { %v659_v44 = vadd.f32 %v641_v52, %v619_v32  ;;  %v540_v45 = vadd.f32 %v522_v33, %v500_v35  ;;  %v602_v46 = vmul.f32 %v3240_v18, %v393_v62  ;;  %v3338_v47 = vmul.f32 %v3240_v18, %v396_v63  ;;  %v3365_v33 = vld [vmem:[%s3232_s25 + $0x4a] sm:$0xff] }
  0x22   : > { %v642_v51 = vmul.f32 %v3247_v22, %v417_v4  ;;  %v682_v55 = vmul.f32 %v3251_v23, %v372_v56  ;;  %v722_v57 = vmul.f32 %v3255_v24, %v396_v63  ;;  %v762_v52 = vmul.f32 %v3278_v40, %v3310_v27 }
  0x23   : > { %v699_v0 = vadd.f32 %v681_v54, %v659_v44  ;;  %v580_v62 = vadd.f32 %v562_v39, %v540_v45  ;;  %v443_v21 = vmul.f32 %v3222_v14, %v367_v42  ;;  %v3355_v28 = vmul.f32 %v3222_v14, %v370_v43  ;;  %v3372_v39 = vld [vmem:[%s4532_s2] ss:$0 sm:$0xff] }
  0x24   : > { %v449_v56 = vmul.f32 %v3222_v14, %v373_v48  ;;  %v450_v63 = vmul.f32 %v3222_v14, %v3259_v26  ;;  %v483_v4 = vmul.f32 %v3226_v15, %v391_v49  ;;  %v3362_v29 = vmul.f32 %v3226_v15, %v394_v50 }
  0x25   : > { %v739_v54 = vadd.f32 %v721_v60, %v699_v0  ;;  %v620_v31 = vadd.f32 %v602_v46, %v580_v62  ;;  %v489_v32 = vmul.f32 %v3226_v15, %v397_v58  ;;  %v490_v35 = vmul.f32 %v3226_v15, %v398_v59 }
  0x26   : > { %v501_v42 = vadd.f32 %v483_v4, %v443_v21  ;;  %v523_v44 = vmul.f32 %v3236_v17, %v415_v1  ;;  %v3376_v45 = vmul.f32 %v3236_v17, %v418_v5  ;;  %v529_v60 = vmul.f32 %v3236_v17, %v421_v20 }
  0x27   : > { %v779_v46 = vadd.f32 %v761_v61, %v739_v54  ;;  %v660_v49 = vadd.f32 %v642_v51, %v620_v31  ;;  %v507_v0 = vadd.f32 %v489_v32, %v449_v56  ;;  %v3379_v62 = vadd.f32 %v490_v35, %v450_v63 }
  0x28   : > { %v3383_v12 = vmul.f32 %v3236_v17, %v3365_v33  ;;  %v541_v9 = vadd.f32 %v523_v44, %v501_v42  ;;  %v563_v13 = vmul.f32 %v3230_v16, %v370_v43  ;;  %v3387_v21 = vmul.f32 %v3230_v16, %v373_v48  ;;  %v375_v42 = vld [vmem:[%s3232_s25 + $0x50] sm:$0xff] }
  0x29   : > { %v804_v1 = vadd.f32 %v3372_v39, %v779_v46  ;;  %v700_v4 = vadd.f32 %v682_v55, %v660_v49  ;;  %v3390_v11 = vadd.f32 %v529_v60, %v507_v0  ;;  %v603_v61 = vmul.f32 %v3240_v18, %v394_v50  ;;  %v399_v46 = vld [vmem:[%s3232_s25 + $0x51] sm:$0xff] }
  0x2a   : > { %v581_v51 = vadd.f32 %v563_v13, %v541_v9  ;;  %v3394_v56 = vmul.f32 %v3240_v18, %v397_v58  ;;  %v3397_v63 = vmul.f32 %v3240_v18, %v398_v59  ;;  %v643_v43 = vmul.f32 %v3247_v22, %v418_v5  ;;  %v3416_v0 = vld [vmem:[%s3232_s25 + $0x52] sm:$0xff] }
  0x2b   : > { %v822_v54 = vmax.f32 %v804_v1, 0.0  ;;  %v740_v31 = vadd.f32 %v722_v57, %v700_v4  ;;  %v3401_v32 = vmul.f32 %v3247_v22, %v421_v20  ;;  %v662_v55 = vadd.f32 %v3290_v53, %v622_v34 }
  0x2c   : > { %v621_v35 = vadd.f32 %v603_v61, %v581_v51  ;;  %v683_v9 = vmul.f32 %v3251_v23, %v373_v48  ;;  %v684_v13 = vmul.f32 %v3251_v23, %v3259_v26  ;;  %v723_v50 = vmul.f32 %v3255_v24, %v397_v58 }
  0x2d   : > { %v858_v44 = vcombine.high %v822_v54, %v822_v54  ;;  %v865_v5 = vrot.slane %v822_v54, %v3302_v3  ;;  %v780_v60 = vadd.f32 %v762_v52, %v740_v31  ;;  %v724_v57 = vmul.f32 %v3255_v24, %v398_v59 }
  0x2e   : > { %v661_v49 = vadd.f32 %v643_v43, %v621_v35  ;;  %v702_v53 = vadd.f32 %v684_v13, %v662_v55  ;;  %v763_v34 = vmul.f32 %v3278_v40, %v421_v20  ;;  %v764_v48 = vmul.f32 %v3278_v40, %v3365_v33 }
  0x2f   : > { %v872_v26 = vrot.slane %v858_v44, %v3302_v3  ;;  %v873_v58 = vcombine.high %v865_v5, %v865_v5  ;;  %v805_v1 = vadd.f32 %v3372_v39, %v780_v60  ;;  %v451_v52 = vmul.f32 %v3222_v14, %v375_v42 }
  0x30   : > { %v701_v4 = vadd.f32 %v683_v9, %v661_v49  ;;  %v742_v59 = vadd.f32 %v724_v57, %v702_v53  ;;  %v491_v61 = vmul.f32 %v3226_v15, %v399_v46  ;;  %v503_v51 = vadd.f32 %v3317_v25, %v3307_v19 }
  0x31   : > { %v874_v20 = vcombine.high %v872_v26, %v872_v26  ;;  %v1112_v43 = vcombine.low %v865_v5, %v873_v58  ;;  %v823_v54 = vmax.f32 %v805_v1, 0.0  ;;  %v3426_v31 = vmul.f32 %v3236_v17, %v3416_v0 }
  0x32   : > { %v741_v55 = vadd.f32 %v723_v50, %v701_v4  ;;  %v782_v35 = vadd.f32 %v764_v48, %v742_v59  ;;  %v3428_v13 = vadd.f32 %v491_v61, %v451_v52  ;;  %v543_v44 = vadd.f32 %v3322_v36, %v503_v51 }
  0x33   : > { %v1113_v9 = vcombine.low %v872_v26, %v874_v20  ;;  %v1120_v60 = vrot.slane %v1112_v43, %v3302_v3  ;;  %v875_v57 = vcombine.high %v823_v54, %v823_v54  ;;  %v882_v49 = vrot.slane %v823_v54, %v3302_v3 }
  0x34   : > { %v781_v19 = vadd.f32 %v763_v34, %v741_v55  ;;  %v807_v25 = vadd.f32 %v3372_v39, %v782_v35  ;;  %v3435_v5 = vmul.f32 %v3230_v16, %v375_v42  ;;  %v583_v53 = vadd.f32 %v3332_v41, %v543_v44  ;;  %v376_v55 = vld [vmem:[%s3232_s25 + $0x58] sm:$0x3]  ;;  %v377_v35 = vld [vmem:[%s3232_s25 + $0x60] sm:$0xff] }
  0x35   : > { %v1127_v50 = vrot.slane %v1113_v9, %v3302_v3  ;;  %v889_v48 = vrot.slane %v875_v57, %v3302_v3  ;;  %v890_v36 = vcombine.high %v882_v49, %v882_v49  ;;  %v3441_v26 = vmul.f32 %v3240_v18, %v399_v46  ;;  %v400_v44 = vld [vmem:[%s3232_s25 + $0x59] sm:$0x3] }
  0x36   : > { %v806_v34 = vadd.f32 %v3372_v39, %v781_v19  ;;  %v825_v58 = vmax.f32 %v807_v25, 0.0  ;;  %v623_v1 = vadd.f32 %v3338_v47, %v583_v53  ;;  %v645_v52 = vmul.f32 %v3247_v22, %v3310_v27  ;;  %v401_v25 = vld [vmem:[%s3232_s25 + $0x61] sm:$0xff] }
  0x37   : > { %v1128_v41 = vcombine.low %v1120_v60, %v1127_v50  ;;  %v891_v4 = vcombine.high %v889_v48, %v889_v48  ;;  %v1129_v59 = vcombine.low %v882_v49, %v890_v36  ;;  %v685_v61 = vmul.f32 %v3251_v23, %v375_v42  ;;  %v424_v50 = vld [vmem:[%s3232_s25 + $0x5a] sm:$0x3] }
  0x38   : > { %v824_v51 = vmax.f32 %v806_v34, 0.0  ;;  %v899_v20 = vcombine.high %v825_v58, %v825_v58  ;;  %v906_v43 = vrot.slane %v825_v58, %v3302_v3  ;;  %v663_v54 = vadd.f32 %v645_v52, %v623_v1 }
  0x39   : > { %2981 = vmatprep.mubr.msk.f32.mxu0 %vm1341_vm1, %v1128_v41  ;;  %v1130_v47 = vcombine.low %v889_v48, %v891_v4  ;;  %v1137_v27 = vrot.slane %v1129_v59, %v3302_v3  ;;  %v725_v9 = vmul.f32 %v3255_v24, %v399_v46  ;;  %v765_v42 = vmul.f32 %v3278_v40, %v3416_v0  ;;  %v3466_v41 = vld [vmem:[%s3232_s25 + $0x62] sm:$0xff] }
  0x3a   : > { %v898_v60 = vrot.slane %v824_v51, %v3302_v3  ;;  %v913_v57 = vrot.slane %v899_v20, %v3302_v3  ;;  %v914_v49 = vcombine.high %v906_v43, %v906_v43  ;;  %v703_v19 = vadd.f32 %v685_v61, %v663_v54 }
  0x3b   : > { %v1144_v53 = vrot.slane %v1130_v47, %v3302_v3  ;;  %v452_v48 = vmul.f32 %v3222_v14, %v376_v55  ;;  %v453_v36 = vmul.f32 %v3222_v14, %v377_v35  ;;  %v492_v46 = vmul.f32 %v3226_v15, %v400_v44 }
  0x3c   : > { %v1146_v34 = vcombine.low %v898_v60, %v906_v43  ;;  %v1147_v58 = vcombine.low %v914_v49, %v913_v57  ;;  %v743_v1 = vadd.f32 %v725_v9, %v703_v19  ;;  %v915_v52 = vcombine.high %v913_v57, %v913_v57 }
  0x3d   : > { %v1145_v4 = vcombine.low %v1137_v27, %v1144_v53  ;;  %v493_v59 = vmul.f32 %v3226_v15, %v401_v25  ;;  %v504_v61 = vadd.f32 %v3362_v29, %v3355_v28  ;;  %v510_v51 = vadd.f32 %v492_v46, %v452_v48  ;;  %v378_v46 = vld [vmem:[%s3232_s25 + $0x68] sm:$0xff] }
  0x3e   : > { %v1154_v20 = vrot.slane %v1146_v34, %v3302_v3  ;;  %v1161_v54 = vrot.slane %v1147_v58, %v3302_v3  ;;  %v783_v47 = vadd.f32 %v765_v42, %v743_v1  ;;  %v532_v10 = vmul.f32 %v3236_v17, %v424_v50  ;;  %v402_v34 = vld [vmem:[%s3232_s25 + $0x69] sm:$0xff] }
  0x3f   : > { %2982 = vmatmul.mubr.msk.f32.vlgmr.msra.gmra.mxu0 %vm1341_vm1, %v1145_v4  ;;  %v3475_v43 = vadd.f32 %v493_v59, %v453_v36  ;;  %v3479_v27 = vmul.f32 %v3236_v17, %v3466_v41  ;;  %v544_v9 = vadd.f32 %v3376_v45, %v504_v61  ;;  %v3483_v28 = vmul.f32 %v3230_v16, %v376_v55 }
  0x40   : > { %v1162_v29 = vcombine.low %v1154_v20, %v1161_v54  ;;  %v808_v42 = vadd.f32 %v3372_v39, %v783_v47  ;;  %v3486_v60 = vadd.f32 %v532_v10, %v510_v51  ;;  %v3489_v57 = vmul.f32 %v3230_v16, %v377_v35  ;;  %v3516_v51 = vld [vmem:[%s3232_s25 + $0x6a] sm:$0xff] }
  0x41   : > { %v584_v49 = vadd.f32 %v3387_v21, %v544_v9  ;;  %v3493_v19 = vmul.f32 %v3240_v18, %v400_v44  ;;  %v3496_v53 = vmul.f32 %v3240_v18, %v401_v25  ;;  %v625_v45 = vadd.f32 %v3397_v63, %v3314_v30 }
  0x42   : > { %2984 = vmatprep.mubr.msk.f32.mxu0 %vm1341_vm1, %v1162_v29  ;;  %v826_v48 = vmax.f32 %v808_v42, 0.0  ;;  %v647_v10 = vmul.f32 %v3247_v22, %v3365_v33  ;;  %v3504_v36 = vmul.f32 %v3247_v22, %v424_v50  ;;  %v686_v21 = vmul.f32 %v3251_v23, %v376_v55 }
  0x43   : > { %v624_v58 = vadd.f32 %v3394_v56, %v584_v49  ;;  %v687_v1 = vmul.f32 %v3251_v23, %v377_v35  ;;  %v726_v30 = vmul.f32 %v3255_v24, %v400_v44  ;;  %v727_v63 = vmul.f32 %v3255_v24, %v401_v25 }
  0x44   : > { %v916_v4 = vcombine.high %v826_v48, %v826_v48  ;;  %v923_v59 = vrot.slane %v826_v48, %v3302_v3  ;;  %v665_v61 = vadd.f32 %v647_v10, %v625_v45  ;;  %v766_v33 = vmul.f32 %v3278_v40, %v424_v50 }
  0x45   : > { %v664_v55 = vadd.f32 %v3401_v32, %v624_v58  ;;  %v767_v20 = vmul.f32 %v3278_v40, %v3466_v41  ;;  %v454_v56 = vmul.f32 %v3222_v14, %v378_v46  ;;  %v494_v35 = vmul.f32 %v3226_v15, %v402_v34 }
  0x46   : > { %v930_v44 = vrot.slane %v916_v4, %v3302_v3  ;;  %v931_v25 = vcombine.high %v923_v59, %v923_v59  ;;  %v1163_v54 = vcombine.low %v915_v52, %v923_v59  ;;  %v705_v47 = vadd.f32 %v687_v1, %v665_v61  ;;  %v379_v1 = vld [vmem:[%s3232_s25 + $0x70] sm:$0x3]  ;;  %v380_v4 = vld [vmem:[%s3232_s25 + $0x78] sm:$0xff] }
  0x47   : > { %v704_v9 = vadd.f32 %v686_v21, %v664_v55  ;;  %v3524_v50 = vadd.f32 %v494_v35, %v454_v56  ;;  %v3528_v32 = vmul.f32 %v3236_v17, %v3516_v51  ;;  %v546_v29 = vadd.f32 %v3328_v38, %v3324_v37  ;;  %v403_v59 = vld [vmem:[%s3232_s25 + $0x71] sm:$0x3]  ;;  %v404_v61 = vld [vmem:[%s3232_s25 + $0x79] sm:$0xff] }
  0x48   : > { %v1164_v42 = vcombine.low %v931_v25, %v930_v44  ;;  %v1171_v49 = vrot.slane %v1163_v54, %v3302_v3  ;;  %v745_v45 = vadd.f32 %v727_v63, %v705_v47  ;;  %v932_v48 = vcombine.high %v930_v44, %v930_v44  ;;  %v427_v44 = vld [vmem:[%s3232_s25 + $0x72] sm:$0x3]  ;;  %v3554_v25 = vld [vmem:[%s3232_s25 + $0x7a] sm:$0xff] }
  0x49   : > { %v744_v10 = vadd.f32 %v726_v30, %v704_v9  ;;  %v3534_v52 = vmul.f32 %v3230_v16, %v378_v46  ;;  %v586_v21 = vadd.f32 %v3435_v5, %v546_v29  ;;  %v3538_v58 = vmul.f32 %v3240_v18, %v402_v34 }
  0x4a   : > { %v1178_v37 = vrot.slane %v1164_v42, %v3302_v3  ;;  %v785_v38 = vadd.f32 %v767_v20, %v745_v45  ;;  %v648_v63 = vmul.f32 %v3247_v22, %v3416_v0  ;;  %v688_v30 = vmul.f32 %v3251_v23, %v378_v46 }
  0x4b   : > { %v784_v55 = vadd.f32 %v766_v33, %v744_v10  ;;  %v626_v56 = vadd.f32 %v3441_v26, %v586_v21  ;;  %v728_v5 = vmul.f32 %v3255_v24, %v402_v34  ;;  %v768_v35 = vmul.f32 %v3278_v40, %v3516_v51 }
  0x4c   : > { %v1179_v54 = vcombine.low %v1171_v49, %v1178_v37  ;;  %v810_v20 = vadd.f32 %v3372_v39, %v785_v38  ;;  %v455_v0 = vmul.f32 %v3222_v14, %v379_v1  ;;  %v456_v46 = vmul.f32 %v3222_v14, %v380_v4 }
  0x4d   : > { %v809_v47 = vadd.f32 %v3372_v39, %v784_v55  ;;  %v666_v33 = vadd.f32 %v648_v63, %v626_v56  ;;  %v495_v26 = vmul.f32 %v3226_v15, %v403_v59  ;;  %v496_v34 = vmul.f32 %v3226_v15, %v404_v61 }
  0x4e   : > { %2985 = vmatmul.mubr.msk.f32.gmra.mxu0 %vm1341_vm1, %v1179_v54  ;;  %v828_v9 = vmax.f32 %v810_v20, 0.0  ;;  %v535_v29 = vmul.f32 %v3236_v17, %v427_v44  ;;  %v3566_v42 = vmul.f32 %v3236_v17, %v3554_v25  ;;  %v548_v49 = vadd.f32 %v3383_v12, %v3379_v62 }
  0x4f   : > { %v827_v45 = vmax.f32 %v809_v47, 0.0  ;;  %v706_v10 = vadd.f32 %v688_v30, %v666_v33  ;;  %v513_v21 = vadd.f32 %v495_v26, %v455_v0  ;;  %v3570_v37 = vadd.f32 %v496_v34, %v456_v46 }
  0x50   : > { %v947_v38 = vrot.slane %v828_v9, %v3302_v3  ;;  %v940_v63 = vcombine.high %v828_v9, %v828_v9  ;;  %v3574_v55 = vmul.f32 %v3230_v16, %v379_v1  ;;  %v3577_v56 = vmul.f32 %v3230_v16, %v380_v4 }
  0x51   : > { %v939_v54 = vrot.slane %v827_v45, %v3302_v3  ;;  %v746_v20 = vadd.f32 %v728_v5, %v706_v10  ;;  %v3580_v8 = vadd.f32 %v535_v29, %v513_v21  ;;  %v587_v12 = vadd.f32 %v3483_v28, %v3390_v11 }
  0x52   : > { %v955_v62 = vcombine.high %v947_v38, %v947_v38  ;;  %v954_v30 = vrot.slane %v940_v63, %v3302_v3  ;;  %v588_v0 = vadd.f32 %v3489_v57, %v548_v49  ;;  %v3587_v46 = vmul.f32 %v3240_v18, %v403_v59  ;;  %v405_v63 = vld [vmem:[%s3232_s25 + $0x81] sm:$0xff] }
  0x53   : > { %v1180_v47 = vcombine.low %v932_v48, %v939_v54  ;;  %v786_v33 = vadd.f32 %v768_v35, %v746_v20  ;;  %v3590_v26 = vmul.f32 %v3240_v18, %v404_v61  ;;  %v627_v5 = vadd.f32 %v3493_v19, %v587_v12 }
  0x54   : > { %v1181_v34 = vcombine.low %v947_v38, %v955_v62  ;;  %v956_v9 = vcombine.high %v954_v30, %v954_v30  ;;  %v628_v11 = vadd.f32 %v3496_v53, %v588_v0  ;;  %v650_v28 = vmul.f32 %v3247_v22, %v3466_v41 }
  0x55   : > { %v1188_v57 = vrot.slane %v1180_v47, %v3302_v3  ;;  %v811_v29 = vadd.f32 %v3372_v39, %v786_v33  ;;  %v3599_v48 = vmul.f32 %v3247_v22, %v427_v44  ;;  %v667_v35 = vadd.f32 %v3504_v36, %v627_v5 }
  0x56   : > { %v1195_v49 = vrot.slane %v1181_v34, %v3302_v3  ;;  %v1197_v19 = vcombine.low %v954_v30, %v956_v9  ;;  %v668_v45 = vadd.f32 %v650_v28, %v628_v11  ;;  %v689_v10 = vmul.f32 %v3251_v23, %v379_v1  ;;  %v382_v11 = vld [vmem:[%s3232_s25 + $0x88] sm:$0x3] }
  0x57   : > { %v829_v53 = vmax.f32 %v811_v29, 0.0  ;;  %v690_v21 = vmul.f32 %v3251_v23, %v380_v4  ;;  %v729_v41 = vmul.f32 %v3255_v24, %v403_v59  ;;  %v730_v38 = vmul.f32 %v3255_v24, %v404_v61  ;;  %v3614_v4 = vld [vmem:[%s3232_s25 + $0x80] sm:$0xff] }
  0x58   : > { %v1196_v54 = vcombine.low %v1188_v57, %v1195_v49  ;;  %v1205_v20 = vrot.slane %v1197_v19, %v3302_v3  ;;  %v707_v12 = vadd.f32 %v689_v10, %v667_v35  ;;  %v769_v36 = vmul.f32 %v3278_v40, %v427_v44 }
  0x59   : > { %v964_v62 = vrot.slane %v829_v53, %v3302_v3  ;;  %v708_v30 = vadd.f32 %v690_v21, %v668_v45  ;;  %v770_v1 = vmul.f32 %v3278_v40, %v3554_v25  ;;  %v957_v0 = vcombine.high %v829_v53, %v829_v53  ;;  %v3638_v45 = vld [vmem:[%s3232_s25 + $0x82] sm:$0xff]  ;;  %v430_v53 = vld [vmem:[%s3232_s25 + $0x8a] sm:$0x3] }
  0x5a   : > { %2987 = vmatprep.mubr.msk.f32.mxu0 %vm1341_vm1, %v1196_v54  ;;  %v747_v59 = vadd.f32 %v729_v41, %v707_v12  ;;  %v3618_v61 = vmul.f32 %v3226_v15, %v405_v63  ;;  %v549_v44 = vadd.f32 %v3426_v31, %v3428_v13  ;;  %v3624_v47 = vmul.f32 %v3230_v16, %v3614_v4  ;;  %v406_v13 = vld [vmem:[%s3232_s25 + $0x89] sm:$0x3] }
  0x5b   : > { %v972_v33 = vcombine.high %v964_v62, %v964_v62  ;;  %v748_v5 = vadd.f32 %v730_v38, %v708_v30  ;;  %v971_v34 = vrot.slane %v957_v0, %v3302_v3  ;;  %v3628_v9 = vmul.f32 %v3240_v18, %v405_v63 }
  0x5c   : > { %v787_v28 = vadd.f32 %v769_v36, %v747_v59  ;;  %v589_v57 = vadd.f32 %v3534_v52, %v549_v44  ;;  %v651_v29 = vmul.f32 %v3247_v22, %v3516_v51  ;;  %v691_v31 = vmul.f32 %v3251_v23, %v3614_v4 }
  0x5d   : > { %v1198_v35 = vcombine.low %v964_v62, %v972_v33  ;;  %v788_v49 = vadd.f32 %v770_v1, %v748_v5  ;;  %v973_v19 = vcombine.high %v971_v34, %v971_v34  ;;  %v731_v10 = vmul.f32 %v3255_v24, %v405_v63 }
  0x5e   : > { %v812_v21 = vadd.f32 %v3372_v39, %v787_v28  ;;  %v629_v41 = vadd.f32 %v3538_v58, %v589_v57  ;;  %v771_v52 = vmul.f32 %v3278_v40, %v3638_v45  ;;  %v458_v51 = vmul.f32 %v3222_v14, %v382_v11 }
  0x5f   : > { %v1212_v38 = vrot.slane %v1198_v35, %v3302_v3  ;;  %v813_v54 = vadd.f32 %v3372_v39, %v788_v49  ;;  %v1214_v12 = vcombine.low %v971_v34, %v973_v19  ;;  %v498_v36 = vmul.f32 %v3226_v15, %v406_v13  ;;  %v383_v35 = vld [vmem:[%s3232_s25 + $0x90] sm:$0xff] }
  0x60   : > { %v830_v62 = vmax.f32 %v812_v21, 0.0  ;;  %v669_v30 = vadd.f32 %v651_v29, %v629_v41  ;;  %v538_v63 = vmul.f32 %v3236_v17, %v430_v53  ;;  %v3652_v1 = vmul.f32 %v3230_v16, %v382_v11  ;;  %v407_v19 = vld [vmem:[%s3232_s25 + $0x91] sm:$0xff] }
  0x61   : > { %v1213_v58 = vcombine.low %v1205_v20, %v1212_v38  ;;  %v831_v0 = vmax.f32 %v813_v54, 0.0  ;;  %v1222_v59 = vrot.slane %v1214_v12, %v3302_v3  ;;  %v516_v44 = vadd.f32 %v498_v36, %v458_v51  ;;  %v431_v36 = vld [vmem:[%s3232_s25 + $0x92] sm:$0xff] }
  0x62   : > { %v980_v33 = vrot.slane %v830_v62, %v3302_v3  ;;  %v709_v5 = vadd.f32 %v691_v31, %v669_v30  ;;  %v590_v15 = vadd.f32 %v3574_v55, %v3486_v60  ;;  %v3659_v34 = vmul.f32 %v3240_v18, %v406_v13 }
  0x63   : > { %2988 = vmatmul.mubr.msk.f32.gmra.mxu0 %vm1341_vm1, %v1213_v58  ;;  %v988_v28 = vrot.slane %v831_v0, %v3302_v3  ;;  %v981_v20 = vcombine.high %v831_v0, %v831_v0  ;;  %v3663_v57 = vadd.f32 %v538_v63, %v516_v44  ;;  %v3666_v29 = vmul.f32 %v3247_v22, %v430_v53 }
  0x64   : > { %v749_v49 = vadd.f32 %v731_v10, %v709_v5  ;;  %v630_v31 = vadd.f32 %v3587_v46, %v590_v15  ;;  %v692_v60 = vmul.f32 %v3251_v23, %v382_v11  ;;  %v732_v55 = vmul.f32 %v3255_v24, %v406_v13 }
  0x65   : > { %v1215_v21 = vcombine.low %v980_v33, %v988_v28  ;;  %v995_v41 = vrot.slane %v981_v20, %v3302_v3  ;;  %v996_v51 = vcombine.high %v988_v28, %v988_v28  ;;  %v772_v38 = vmul.f32 %v3278_v40, %v430_v53  ;;  %v3692_v28 = vld [vmem:[%s3232_s25 + $0x98] sm:$0xff] }
  0x66   : > { %v789_v54 = vadd.f32 %v771_v52, %v749_v49  ;;  %v670_v12 = vadd.f32 %v3599_v48, %v630_v31  ;;  %v551_v10 = vadd.f32 %v3479_v27, %v3475_v43  ;;  %v576_v46 = vmul.f32 %v3230_v16, %v383_v35 }
  0x67   : > { %v1229_v11 = vrot.slane %v1215_v21, %v3302_v3  ;;  %v997_v13 = vcombine.high %v995_v41, %v995_v41  ;;  %v1231_v62 = vcombine.low %v996_v51, %v995_v41  ;;  %v616_v30 = vmul.f32 %v3240_v18, %v407_v19  ;;  %v386_v51 = vld [vmem:[%s3232_s25 + $0xa8] sm:$0xff] }
  0x68   : > { %v814_v63 = vadd.f32 %v3372_v39, %v789_v54  ;;  %v710_v53 = vadd.f32 %v692_v60, %v670_v12  ;;  %v591_v52 = vadd.f32 %v3577_v56, %v551_v10  ;;  %v653_v48 = vmul.f32 %v3247_v22, %v3554_v25  ;;  %v3695_v56 = vld [vmem:[%s3232_s25 + $0x99] sm:$0xff] }
  0x69   : > { %v1230_v58 = vcombine.low %v1222_v59, %v1229_v11  ;;  %v1239_v43 = vrot.slane %v1231_v62, %v3302_v3  ;;  %v656_v27 = vmul.f32 %v3247_v22, %v431_v36  ;;  %v693_v0 = vmul.f32 %v3251_v23, %v383_v35  ;;  %v410_v62 = vld [vmem:[%s3232_s25 + $0xa9] sm:$0xff] }
  0x6a   : > { %v832_v44 = vmax.f32 %v814_v63, 0.0  ;;  %v750_v33 = vadd.f32 %v732_v55, %v710_v53  ;;  %v631_v5 = vadd.f32 %v3590_v26, %v591_v52  ;;  %v733_v15 = vmul.f32 %v3255_v24, %v407_v19  ;;  %v3707_v55 = vld [vmem:[%s3232_s25 + $0x9a] sm:$0xff]  ;;  %v411_v53 = vld [vmem:[%s3232_s25 + $0xb1] sm:$0xff] }
  0x6b   : > { %2990 = vmatprep.mubr.msk.f32.mxu0 %vm1341_vm1, %v1230_v58  ;;  %v773_v25 = vmul.f32 %v3278_v40, %v431_v36  ;;  %v457_v59 = vmul.f32 %v3222_v14, %v3614_v4  ;;  %v537_v20 = vmul.f32 %v3236_v17, %v3638_v45  ;;  %v554_v26 = vadd.f32 %v3566_v42, %v3570_v37  ;;  %v434_v52 = vld [vmem:[%s3232_s25 + $0xaa] sm:$0xff] }
  0x6c   : > { %v1005_v35 = vrot.slane %v832_v44, %v3302_v3  ;;  %v790_v49 = vadd.f32 %v772_v38, %v750_v33  ;;  %v998_v31 = vcombine.high %v832_v44, %v832_v44  ;;  %v671_v60 = vadd.f32 %v653_v48, %v631_v5  ;;  %v435_v48 = vld [vmem:[%s3232_s25 + $0xb2] sm:$0xff] }
  0x6d   : > { %v515_v19 = vadd.f32 %v3618_v61, %v457_v59  ;;  %v577_v14 = vmul.f32 %v3230_v16, %v3692_v28  ;;  %v594_v4 = vadd.f32 %v576_v46, %v554_v26  ;;  %v617_v17 = vmul.f32 %v3240_v18, %v3695_v56  ;;  %v387_v61 = vld [vmem:[%s3232_s25 + $0xb0] sm:$0xff] }
  0x6e   : > { %v1232_v21 = vcombine.low %v997_v13, %v1005_v35  ;;  %v815_v42 = vadd.f32 %v3372_v39, %v790_v49  ;;  %v1012_v37 = vrot.slane %v998_v31, %v3302_v3  ;;  %v1013_v41 = vcombine.high %v1005_v35, %v1005_v35  ;;  %v388_v31 = vld [vmem:[%s3232_s25 + $0xb8] sm:$0x3] }
  0x6f   : > { %v711_v38 = vadd.f32 %v693_v0, %v671_v60  ;;  %v555_v54 = vadd.f32 %v537_v20, %v515_v19  ;;  %v634_v12 = vadd.f32 %v616_v30, %v594_v4  ;;  %v657_v36 = vmul.f32 %v3247_v22, %v3707_v55  ;;  %v385_v20 = vld [vmem:[%s3232_s25 + $0xa0] sm:$0x3] }
  0x70   : > { %v1246_v10 = vrot.slane %v1232_v21, %v3302_v3  ;;  %v833_v46 = vmax.f32 %v815_v42, 0.0  ;;  %v1014_v11 = vcombine.high %v1012_v37, %v1012_v37  ;;  %v1248_v13 = vcombine.low %v1013_v41, %v1012_v37  ;;  %v409_v60 = vld [vmem:[%s3232_s25 + $0xa1] sm:$0x3]  ;;  %v412_v42 = vld [vmem:[%s3232_s25 + $0xb9] sm:$0x3] }
  0x71   : > { %v751_v63 = vadd.f32 %v733_v15, %v711_v38  ;;  %v595_v58 = vadd.f32 %v577_v14, %v555_v54  ;;  %v674_v0 = vadd.f32 %v656_v27, %v634_v12  ;;  %v696_v30 = vmul.f32 %v3251_v23, %v386_v51  ;;  %v3734_v27 = vld [vmem:[%s3232_s25 + $0xa2] sm:$0x3]  ;;  %v436_v37 = vld [vmem:[%s3232_s25 + $0xba] sm:$0x3] }
  0x72   : > { %v1247_v44 = vcombine.low %v1239_v43, %v1246_v10  ;;  %v1021_v33 = vrot.slane %v833_v46, %v3302_v3  ;;  %v1256_v5 = vrot.slane %v1248_v13, %v3302_v3  ;;  %v697_v59 = vmul.f32 %v3251_v23, %v387_v61 }
  0x73   : > { %v791_v15 = vadd.f32 %v773_v25, %v751_v63  ;;  %v635_v26 = vadd.f32 %v617_v17, %v595_v58  ;;  %v714_v35 = vadd.f32 %v696_v30, %v674_v0  ;;  %v736_v49 = vmul.f32 %v3255_v24, %v410_v62 }
  0x74   : > { %2991 = vmatmul.mubr.msk.f32.gmra.mxu0 %vm1341_vm1, %v1247_v44  ;;  %v1249_v43 = vcombine.low %v1014_v11, %v1021_v33  ;;  %v737_v19 = vmul.f32 %v3255_v24, %v411_v53  ;;  %v776_v14 = vmul.f32 %v3278_v40, %v434_v52  ;;  %v777_v4 = vmul.f32 %v3278_v40, %v435_v48 }
  0x75   : > { %v816_v25 = vadd.f32 %v3372_v39, %v791_v15  ;;  %v675_v21 = vadd.f32 %v657_v36, %v635_v26  ;;  %v754_v17 = vadd.f32 %v736_v49, %v714_v35  ;;  %v578_v41 = vmul.f32 %v3230_v16, %v385_v20 }
  0x76   : > { %v1263_v51 = vrot.slane %v1249_v43, %v3302_v3  ;;  %v618_v38 = vmul.f32 %v3240_v18, %v409_v60  ;;  %v658_v61 = vmul.f32 %v3247_v22, %v3734_v27  ;;  %v698_v54 = vmul.f32 %v3251_v23, %v388_v31 }
  0x77   : > { %v834_v12 = vmax.f32 %v816_v25, 0.0  ;;  %v715_v10 = vadd.f32 %v697_v59, %v675_v21  ;;  %v794_v46 = vadd.f32 %v776_v14, %v754_v17  ;;  %v596_v11 = vadd.f32 %v578_v41, %v3663_v57 }
  0x78   : > { %v1264_v36 = vcombine.low %v1256_v5, %v1263_v51  ;;  %v738_v13 = vmul.f32 %v3255_v24, %v412_v42  ;;  %v778_v62 = vmul.f32 %v3278_v40, %v436_v37  ;;  %v552_v16 = vadd.f32 %v3528_v32, %v3524_v50 }
  0x79   : > { %v1022_v63 = vcombine.high %v834_v12, %v834_v12  ;;  %v1029_v18 = vrot.slane %v834_v12, %v3302_v3  ;;  %v755_v53 = vadd.f32 %v737_v19, %v715_v10  ;;  %v819_v52 = vadd.f32 %v3372_v39, %v794_v46 }
  0x7a   : > { %2993 = vmatprep.mubr.msk.f32.mxu0 %vm1341_vm1, %v1264_v36  ;;  %v636_v48 = vadd.f32 %v618_v38, %v596_v11  ;;  %v592_v58 = vadd.f32 %v3624_v47, %v552_v16  ;;  %v654_v57 = vmul.f32 %v3247_v22, %v3638_v45  ;;  %v694_v0 = vmul.f32 %v3251_v23, %v3692_v28 }
  0x7b   : > { %v1036_v30 = vrot.slane %v1022_v63, %v3302_v3  ;;  %v1037_v50 = vcombine.high %v1029_v18, %v1029_v18  ;;  %v795_v32 = vadd.f32 %v777_v4, %v755_v53  ;;  %v837_v44 = vmax.f32 %v819_v52, 0.0 }
  0x7c   : > { %v676_v33 = vadd.f32 %v658_v61, %v636_v48  ;;  %v632_v5 = vadd.f32 %v3628_v9, %v592_v58  ;;  %v734_v59 = vmul.f32 %v3255_v24, %v3695_v56  ;;  %v774_v47 = vmul.f32 %v3278_v40, %v3707_v55 }
  0x7d   : > { %v1038_v15 = vcombine.high %v1036_v30, %v1036_v30  ;;  %v1265_v26 = vcombine.low %v1029_v18, %v1037_v50  ;;  %v820_v22 = vadd.f32 %v3372_v39, %v795_v32  ;;  %v1063_v45 = vcombine.high %v837_v44, %v837_v44 }
  0x7e   : > { %v716_v28 = vadd.f32 %v698_v54, %v676_v33  ;;  %v672_v35 = vadd.f32 %v654_v57, %v632_v5  ;;  %v593_v49 = vadd.f32 %v3652_v1, %v3580_v8  ;;  %v695_v31 = vmul.f32 %v3251_v23, %v385_v20 }
  0x7f   : > { %v1266_v43 = vcombine.low %v1036_v30, %v1038_v15  ;;  %v1273_v9 = vrot.slane %v1265_v26, %v3302_v3  ;;  %v838_v19 = vmax.f32 %v820_v22, 0.0  ;;  %v1077_v56 = vrot.slane %v1063_v45, %v3302_v3 }
  0x80   : > { %v756_v14 = vadd.f32 %v738_v13, %v716_v28  ;;  %v712_v55 = vadd.f32 %v694_v0, %v672_v35  ;;  %v633_v4 = vadd.f32 %v3659_v34, %v593_v49  ;;  %v735_v25 = vmul.f32 %v3255_v24, %v409_v60  ;;  %v2651_v28 = vld [vmem:[%s4537_s7] sm:$0xf] }
  0x81   : > { %v1280_v21 = vrot.slane %v1266_v43, %v3302_v3  ;;  %v1079_v17 = vcombine.high %v1077_v56, %v1077_v56  ;;  %v1080_v42 = vcombine.high %v838_v19, %v838_v19  ;;  %v1087_v8 = vrot.slane %v838_v19, %v3302_v3  ;;  %3002 = vmatprep.subr.msk.mxu1 %vm1370_vm0, %v2651_v28  ;;  %v3810_v35 = vld [vmem:[%s4534_s4] ss:$0 sm:$0xff] }
  0x82   : > { %v796_v1 = vadd.f32 %v778_v62, %v756_v14  ;;  %v752_v23 = vadd.f32 %v734_v59, %v712_v55  ;;  %v673_v20 = vadd.f32 %v3666_v29, %v633_v4  ;;  %v775_v37 = vmul.f32 %v3278_v40, %v3734_v27 }
  0x83   : > { %v1281_v41 = vcombine.low %v1273_v9, %v1280_v21  ;;  %v1094_v51 = vrot.slane %v1080_v42, %v3302_v3  ;;  %v1095_v38 = vcombine.high %v1087_v8, %v1087_v8  ;;  %v1316_v34 = vcombine.low %v1079_v17, %v1087_v8 }
  0x84   : > { %v821_v24 = vadd.f32 %v3372_v39, %v796_v1  ;;  %v792_v60 = vadd.f32 %v774_v47, %v752_v23  ;;  %v713_v61 = vadd.f32 %v695_v31, %v673_v20  ;;  %v1070_v54 = vrot.slane %v837_v44, %v3302_v3 }
  0x85   : > { %2994 = vmatmul.mubr.msk.f32.gmra.mxu0 %vm1341_vm1, %v1281_v41  ;;  %v1317_v12 = vcombine.low %v1095_v38, %v1094_v51  ;;  %v1324_v10 = vrot.slane %v1316_v34, %v3302_v3  ;;  %v1096_v29 = vcombine.high %v1094_v51, %v1094_v51  ;;  %v3822_v34 = vstv %s2937_s21 }
  0x86   : > { %v839_v46 = vmax.f32 %v821_v24, 0.0  ;;  %v817_v40 = vadd.f32 %v3372_v39, %v792_v60  ;;  %v753_v27 = vadd.f32 %v735_v25, %v713_v61  ;;  %v1078_v36 = vcombine.high %v1070_v54, %v1070_v54 }
  0x87   : > { %v1331_v11 = vrot.slane %v1317_v12, %v3302_v3  ;;  %v3825_v24 = vadd.s32 4294967295, %v3199_v2  ;;  %v1776_v12 = vadd.s32 16, %v3199_v2  ;;  %vm1780_vm2 = vcmp.ge.s32.totalorder %v3822_v34, 0 }
  0x88   : > { %v1103_v13 = vrot.slane %v839_v46, %v3302_v3  ;;  %v835_v62 = vmax.f32 %v817_v40, 0.0  ;;  %v793_v16 = vadd.f32 %v775_v37, %v753_v27  ;;  %v1300_v58 = vcombine.low %v1078_v36, %v1077_v56 }
  0x89   : > { %v1332_v63 = vcombine.low %v1324_v10, %v1331_v11  ;;  %vm1786_vm3 = vcmp.lt.s32.totalorder %v3822_v34, 16  ;;  %vm1798_vm4 = vcmp.ge.s32.totalorder %v3825_v24, 0 }
  0x8a   : > { %v1333_v18 = vcombine.low %v1096_v29, %v1103_v13  ;;  %v1039_v53 = vcombine.high %v835_v62, %v835_v62  ;;  %v1046_v52 = vrot.slane %v835_v62, %v3302_v3  ;;  %v818_v48 = vadd.f32 %v3372_v39, %v793_v16  ;;  %vm3839_vm5 = vmand %vm1780_vm2, %vm1786_vm3 }
  0x8b   : > { %2999 = vmatprep.mubr.msk.f32.mxu1 %vm1341_vm1, %v1332_v63  ;;  %v1314_v39 = vrot.slane %v1300_v58, %v3302_v3  ;;  %v3837_v13 = vadd.s32 4294967295, %v1776_v12  ;;  %vm1819_vm6 = vmand %vm3839_vm5, %vm1798_vm4 }
  0x8c   : > { %v1340_v57 = vrot.slane %v1333_v18, %v3302_v3  ;;  %v1053_v0 = vrot.slane %v1039_v53, %v3302_v3  ;;  %v1054_v30 = vcombine.high %v1046_v52, %v1046_v52  ;;  %v836_v50 = vmax.f32 %v818_v48, 0.0  ;;  %v361_v53 = vld [vmem:[%s4535_s5] sm:$0xff] }
  0x8d   : > { %vm1839_vm7 = vcmp.lt.s32.totalorder %v3837_v13, 16 }
  0x8e   : > { %3000 = vmatmul.mubr.msk.f32.vlgmr.msra.gmra.mxu1 %vm1341_vm1, %v1340_v57  ;;  %v1055_v32 = vcombine.high %v1053_v0, %v1053_v0  ;;  %v1282_v44 = vcombine.low %v1046_v52, %v1054_v30  ;;  %v1062_v33 = vrot.slane %v836_v50, %v3302_v3  ;;  %v3855_v57 = vrot.slane %v361_v53, %v479_v7  ;;  %vm1848_vm8 = vmand %vm3839_vm5, %vm1839_vm7 }
  0x8f   : > { %3003 = vmatpush3.msk.msra.mxu1 %vm1370_vm0, %v2651_v28  ;;  %v3869_v7 = vrot.slane %v361_v53, %v439_v6  ;;  %v4551_v6 = vsub.s32 7, %v3199_v2 }
  0x90   : > { %v1283_v5 = vcombine.low %v1053_v0, %v1055_v32  ;;  %v1290_v59 = vrot.slane %v1282_v44, %v3302_v3  ;;  %v1299_v47 = vcombine.low %v1062_v33, %v1070_v54  ;;  %v1768_v33 = vadd.s32 1, %v3822_v34 }
  0x92   : > { %v1297_v15 = vrot.slane %v1283_v5, %v3302_v3  ;;  %v1307_v26 = vrot.slane %v1299_v47, %v3302_v3  ;;  %vm1781_vm10 = vcmp.ge.s32.totalorder %v1768_v33, 0  ;;  %vm1787_vm12 = vcmp.lt.s32.totalorder %v1768_v33, 16 }
  0x93   : > { %vm3916_vm13 = vmand %vm1781_vm10, %vm1787_vm12 }
  0x94   : > { %v1298_v22 = vcombine.low %v1290_v59, %v1297_v15  ;;  %v1315_v45 = vcombine.low %v1307_v26, %v1314_v39  ;;  %v4548_v15 = vsub.s32 2, %v3199_v2  ;;  %vm1822_vm14 = vmand %vm3916_vm13, %vm1798_vm4 }
  0x95   : > { %vm1851_vm15 = vmand %vm3916_vm13, %vm1839_vm7 }
  0x96   : > { %2996 = vmatprep.mubr.msk.f32.mxu0 %vm1341_vm1, %v1298_v22  ;;  %v3874_v26 = vrot.slane %v361_v53, %v4548_v15  ;;  %v4549_v22 = vsub.s32 4, %v3199_v2 }
  0x97   : > { %2997 = vmatmul.mubr.msk.f32.gmra.mxu0 %vm1341_vm1, %v1315_v45 }
  0x98   : > { %v3878_v45 = vrot.slane %v361_v53, %v4549_v22 }
  0xff   : > { %v2983_v49 = vpop.f32.mrf.mxu0 }
 0x100   : > { %v1446_v31 = vadd.f32 %v2983_v49, %v3810_v35  ;;  %v4550_v49 = vsub.s32 5, %v3199_v2 }
 0x101   : > { %v1440_v43 = vpop.f32.mrf.mxu0 }
 0x102   : > { %v1510_v9 = vmax.f32 %v1446_v31, 0.0  ;;  %v1441_v19 = vadd.f32 %v3810_v35, %v1440_v43  ;;  %v3882_v31 = vrot.slane %v361_v53, %v4550_v49  ;;  %v3886_v43 = vrot.slane %v361_v53, %v4551_v6 }
 0x104   : > { %v1554_v56 = vcombine.high %v1510_v9, %v1510_v9  ;;  %v1509_v14 = vmax.f32 %v1441_v19, 0.0  ;;  %v1561_v17 = vrot.slane %v1510_v9, %v3302_v3 }
 0x106   : > { %v1537_v55 = vcombine.high %v1509_v14, %v1509_v14  ;;  %v1568_v4 = vrot.slane %v1554_v56, %v3302_v3  ;;  %v1544_v25 = vrot.slane %v1509_v14, %v3302_v3  ;;  %v1569_v23 = vcombine.high %v1561_v17, %v1561_v17 }
 0x107   : > { %v4552_v56 = vsub.s32 3, %v3199_v2 }
 0x108   : > { %v1551_v21 = vrot.slane %v1537_v55, %v3302_v3  ;;  %v1570_v8 = vcombine.high %v1568_v4, %v1568_v4  ;;  %v1552_v1 = vcombine.high %v1544_v25, %v1544_v25  ;;  %v1917_v61 = vcombine.low %v1561_v17, %v1569_v23 }
 0x109   : > { %v3891_v14 = vrot.slane %v361_v53, %v4552_v56  ;;  %v3896_v17 = vadd.s32 2, %v3822_v34  ;;  %v3904_v23 = vadd.s32 5, %v3822_v34 }
 0x10a   : > { %v1553_v42 = vcombine.high %v1551_v21, %v1551_v21  ;;  %v1918_v41 = vcombine.low %v1568_v4, %v1570_v8  ;;  %v1900_v51 = vcombine.low %v1544_v25, %v1552_v1  ;;  %v1925_v11 = vrot.slane %v1917_v61, %v3302_v3 }
 0x10b   : > { %v3901_v1 = vadd.s32 3, %v3822_v34  ;;  %vm1782_vm0 = vcmp.ge.s32.totalorder %v3896_v17, 0  ;;  %vm1788_vm2 = vcmp.lt.s32.totalorder %v3896_v17, 16  ;;  %vm1785_vm12 = vcmp.ge.s32.totalorder %v3904_v23, 0 }
 0x10c   : > { %v1901_v20 = vcombine.low %v1551_v21, %v1553_v42  ;;  %v1932_v29 = vrot.slane %v1918_v41, %v3302_v3  ;;  %v1908_v46 = vrot.slane %v1900_v51, %v3302_v3  ;;  %vm3986_vm3 = vmand %vm1782_vm0, %vm1788_vm2 }
 0x10d   : > { %vm1789_vm10 = vcmp.lt.s32.totalorder %v3901_v1, 16 }
 0x10e   : > { %v2986_v37 = vpop.f32.mrf.mxu0  ;;  %v1915_v54 = vrot.slane %v1901_v20, %v3302_v3  ;;  %v1933_v63 = vcombine.low %v1925_v11, %v1932_v29 }
 0x10f   : > { %v1456_v40 = vadd.f32 %v2986_v37, %v3810_v35 }
 0x110   : > { %v1450_v38 = vpop.f32.mrf.mxu0  ;;  %v1916_v36 = vcombine.low %v1908_v46, %v1915_v54  ;;  %v2165_v32 = vsel %vm3839_vm5, %v1933_v63, 0.0  ;;  %vm1825_vm5 = vmand %vm3986_vm3, %vm1798_vm4 }
 0x111   : > { %v1451_v60 = vadd.f32 %v3810_v35, %v1450_v38  ;;  %v1512_v18 = vmax.f32 %v1456_v40, 0.0  ;;  %v2207_v59 = vmul.f32 %v3855_v57, %v2165_v32  ;;  %v2272_v41 = vmul.f32 %v3874_v26, %v2165_v32 }
 0x112   : > { %v2164_v58 = vsel %vm1819_vm6, %v1916_v36, 0.0  ;;  %v3910_v38 = vadd.s32 4, %v3822_v34  ;;  %vm1854_vm6 = vmand %vm3986_vm3, %vm1839_vm7 }
 0x113   : > { %v1511_v10 = vmax.f32 %v1451_v60, 0.0  ;;  %v1595_v0 = vrot.slane %v1512_v18, %v3302_v3  ;;  %v2206_v44 = vmul.f32 %v3855_v57, %v2164_v58  ;;  %v1588_v9 = vcombine.high %v1512_v18, %v1512_v18 }
 0x114   : > { %v2232_v4 = vrot.slane %v2207_v59, 1  ;;  %v2271_v25 = vmul.f32 %v3874_v26, %v2164_v58  ;;  %v2186_v20 = vmul.f32 %v3869_v7, %v2164_v58  ;;  %v2297_v18 = vrot.slane %v2272_v41, 2 }
 0x115   : > { %v1571_v27 = vcombine.high %v1511_v10, %v1511_v10  ;;  %v1578_v52 = vrot.slane %v1511_v10, %v3302_v3  ;;  %v2231_v28 = vrot.slane %v2206_v44, 1  ;;  %v1602_v60 = vrot.slane %v1588_v9, %v3302_v3 }
 0x116   : > { %v1603_v29 = vcombine.high %v1595_v0, %v1595_v0 }
 0x117   : > { %v1585_v16 = vrot.slane %v1571_v27, %v3302_v3  ;;  %v1586_v30 = vcombine.high %v1578_v52, %v1578_v52  ;;  %v1940_v50 = vrot.slane %v1578_v52, %v3302_v3  ;;  %v2233_v37 = vsel %vm2230_vm9, %v2231_v28, %v2232_v4 }
 0x118   : > { %v2296_v27 = vrot.slane %v2271_v25, 2  ;;  %v2259_v34 = vadd.f32 %v2233_v37, %v2186_v20  ;;  %v4555_v52 = vsub.s32 6, %v3199_v2  ;;  %v1958_v44 = vcombine.low %v1603_v29, %v1602_v60 }
 0x119   : > { %v1587_v48 = vcombine.high %v1585_v16, %v1585_v16  ;;  %v1941_v47 = vcombine.low %v1586_v30, %v1585_v16  ;;  %v2166_v39 = vsel %vm1848_vm8, %v1940_v50, 0.0  ;;  %v2187_v16 = vmul.f32 %v3869_v7, %v2165_v32 }
 0x11a   : > { %v2208_v55 = vmul.f32 %v3855_v57, %v2166_v39  ;;  %v2273_v40 = vmul.f32 %v3874_v26, %v2166_v39  ;;  %v2298_v33 = vsel %vm2295_vm11, %v2296_v27, %v2297_v18  ;;  %v1604_v59 = vcombine.high %v1602_v60, %v1602_v60 }
 0x11b   : > { %v1942_v5 = vcombine.low %v1587_v48, %v1595_v0  ;;  %v1949_v42 = vrot.slane %v1941_v47, %v3302_v3  ;;  %v3930_v48 = vrot.slane %v361_v53, %v4555_v52  ;;  %v2324_v47 = vadd.f32 %v2298_v33, %v2259_v34 }
 0x11c   : > { %v2234_v46 = vrot.slane %v2208_v55, 1  ;;  %v1966_v56 = vrot.slane %v1958_v44, %v3302_v3  ;;  %vm1783_vm8 = vcmp.ge.s32.totalorder %v3901_v1, 0 }
 0x11d   : > { %v1956_v19 = vrot.slane %v1942_v5, %v3302_v3  ;;  %v2299_v5 = vrot.slane %v2273_v40, 2  ;;  %vm4092_vm0 = vmand %vm1783_vm8, %vm1789_vm10 }
 0x11e   : > { %v2235_v63 = vsel %vm2230_vm9, %v2232_v4, %v2234_v46  ;;  %vm1857_vm2 = vmand %vm4092_vm0, %vm1839_vm7 }
 0x11f   : > { %v1957_v61 = vcombine.low %v1949_v42, %v1956_v19  ;;  %v2260_v22 = vadd.f32 %v2235_v63, %v2187_v16  ;;  %v2300_v55 = vsel %vm2295_vm11, %v2297_v18, %v2299_v5 }
 0x121   : > { %v2167_v50 = vsel %vm1822_vm14, %v1957_v61, 0.0  ;;  %v2325_v37 = vadd.f32 %v2300_v55, %v2260_v22  ;;  %vm1784_vm14 = vcmp.ge.s32.totalorder %v3910_v38, 0 }
 0x122   : > { %v3941_v28 = vmul.f32 %v3855_v57, %v2167_v50  ;;  %v3947_v9 = vmul.f32 %v3874_v26, %v2167_v50  ;;  %v2356_v19 = vmul.f32 %v3878_v45, %v2167_v50  ;;  %v2420_v25 = vmul.f32 %v3882_v31, %v2167_v50 }
 0x123   : > { %v2989_v21 = vpop.f32.mrf.mxu0  ;;  %v2336_v20 = vmul.f32 %v3891_v14, %v2167_v50  ;;  %v3958_v60 = vmul.f32 %v3869_v7, %v2167_v50 }
 0x124   : > { %v1466_v8 = vadd.f32 %v2989_v21, %v3810_v35  ;;  %v2236_v61 = vrot.slane %v3941_v28, 1  ;;  %v2380_v29 = vrot.slane %v2356_v19, 1  ;;  %v2444_v34 = vrot.slane %v2420_v25, 2 }
 0x125   : > { %v1460_v51 = vpop.f32.mrf.mxu0 }
 0x126   : > { %v1514_v54 = vmax.f32 %v1466_v8, 0.0  ;;  %v1461_v12 = vadd.f32 %v3810_v35, %v1460_v51 }
 0x128   : > { %v1622_v11 = vcombine.high %v1514_v54, %v1514_v54  ;;  %v1629_v36 = vrot.slane %v1514_v54, %v3302_v3  ;;  %v1513_v62 = vmax.f32 %v1461_v12, 0.0  ;;  %v2301_v54 = vrot.slane %v3947_v9, 2 }
 0x129   : > { %v2344_v12 = vadd.f32 %v2336_v20, %v2324_v47 }
 0x12a   : > { %v1636_v58 = vrot.slane %v1622_v11, %v3302_v3  ;;  %v1605_v0 = vcombine.high %v1513_v62, %v1513_v62  ;;  %v1612_v30 = vrot.slane %v1513_v62, %v3302_v3  ;;  %v1637_v32 = vcombine.high %v1629_v36, %v1629_v36 }
 0x12c   : > { %v1619_v39 = vrot.slane %v1605_v0, %v3302_v3  ;;  %v1620_v15 = vcombine.high %v1612_v30, %v1612_v30  ;;  %v1638_v2 = vcombine.high %v1636_v58, %v1636_v58  ;;  %v1959_v53 = vcombine.low %v1604_v59, %v1612_v30 }
 0x12d   : > { %v1983_v21 = vcombine.low %v1629_v36, %v1637_v32 }
 0x12e   : > { %v1621_v49 = vcombine.high %v1619_v39, %v1619_v39  ;;  %v1981_v6 = vrot.slane %v1620_v15, %v3302_v3  ;;  %v1973_v4 = vrot.slane %v1959_v53, %v3302_v3  ;;  %v3955_v41 = vcombine.low %v1636_v58, %v1638_v2 }
 0x12f   : > { %v1997_v11 = vrot.slane %v1983_v21, %v3302_v3 }
 0x130   : > { %v1982_v42 = vcombine.low %v1619_v39, %v1621_v49  ;;  %v2169_v8 = vsel %vm1851_vm15, %v1981_v6, 0.0  ;;  %v1974_v51 = vcombine.low %v1966_v56, %v1973_v4  ;;  %v2007_v18 = vrot.slane %v3955_v41, %v3302_v3 }
 0x131   : > { %v2211_v40 = vmul.f32 %v3855_v57, %v2169_v8  ;;  %v2276_v27 = vmul.f32 %v3874_v26, %v2169_v8  ;;  %v2358_v16 = vmul.f32 %v3878_v45, %v2169_v8  ;;  %v2422_v50 = vmul.f32 %v3882_v31, %v2169_v8 }
 0x132   : > { %v2168_v46 = vsel %vm3916_vm13, %v1974_v51, 0.0  ;;  %v1990_v36 = vrot.slane %v1982_v42, %v3302_v3  ;;  %vm1791_vm13 = vcmp.lt.s32.totalorder %v3904_v23, 16  ;;  %vm1790_vm15 = vcmp.lt.s32.totalorder %v3910_v38, 16 }
 0x133   : > { %v2210_v62 = vmul.f32 %v3855_v57, %v2168_v46  ;;  %v3973_v10 = vmul.f32 %v3874_v26, %v2168_v46  ;;  %v2357_v52 = vmul.f32 %v3878_v45, %v2168_v46  ;;  %v2421_v58 = vmul.f32 %v3882_v31, %v2168_v46 }
 0x134   : > { %v2992_v63 = vpop.f32.mrf.mxu0  ;;  %v2337_v30 = vmul.f32 %v3891_v14, %v2168_v46  ;;  %v2239_v5 = vrot.slane %v2211_v40, 1  ;;  %v2304_v59 = vrot.slane %v2276_v27, 2  ;;  %v1998_v39 = vcombine.low %v1990_v36, %v1997_v11 }
 0x135   : > { %v2237_v0 = vrot.slane %v2210_v62, 1  ;;  %v1476_v44 = vadd.f32 %v2992_v63, %v3810_v35  ;;  %v2381_v47 = vrot.slane %v2357_v52, 1  ;;  %v2189_v15 = vmul.f32 %v3869_v7, %v2168_v46  ;;  %v4016_v63 = vld [vmem:[%s4535_s5 + $0x8] ss:$0 sm:$0xff] }
 0x136   : > { %v1470_v33 = vpop.f32.mrf.mxu0  ;;  %v2383_v22 = vrot.slane %v2358_v16, 1  ;;  %v2302_v6 = vrot.slane %v3973_v10, 2  ;;  %v2445_v19 = vrot.slane %v2421_v58, 2  ;;  %v2345_v55 = vadd.f32 %v2337_v30, %v2325_v37 }
 0x137   : > { %v1471_v32 = vadd.f32 %v3810_v35, %v1470_v33  ;;  %v1516_v2 = vmax.f32 %v1476_v44, 0.0  ;;  %v2240_v49 = vsel %vm2230_vm9, %v2237_v0, %v2239_v5  ;;  %v2382_v17 = vsel %vm2230_vm9, %v2380_v29, %v2381_v47 }
 0x138   : > { %v2384_v21 = vsel %vm2230_vm9, %v2381_v47, %v2383_v22  ;;  %v2408_v20 = vadd.f32 %v2382_v17, %v2344_v12  ;;  %v2262_v41 = vadd.f32 %v2240_v49, %v2189_v15  ;;  %v4003_v40 = vsel %vm1825_vm5, %v1998_v39, 0.0  ;;  %vm4137_vm5 = vmand %vm1785_vm12, %vm1791_vm13 }
 0x139   : > { %v1515_v56 = vmax.f32 %v1471_v32, 0.0  ;;  %v1656_v4 = vcombine.high %v1516_v2, %v1516_v2  ;;  %v1663_v25 = vrot.slane %v1516_v2, %v3302_v3  ;;  %v2447_v27 = vrot.slane %v2422_v50, 2  ;;  %vm1863_vm10 = vmand %vm4137_vm5, %vm1839_vm7 }
 0x13a   : > { %v2446_v36 = vsel %vm2295_vm11, %v2444_v34, %v2445_v19  ;;  %v2305_v29 = vsel %vm2295_vm11, %v2302_v6, %v2304_v59  ;;  %v2409_v62 = vadd.f32 %v2384_v21, %v2345_v55  ;;  %v2504_v58 = vmul.f32 %v3886_v43, %v4003_v40 }
 0x13b   : > { %v1639_v42 = vcombine.high %v1515_v56, %v1515_v56  ;;  %v1646_v8 = vrot.slane %v1515_v56, %v3302_v3  ;;  %v4001_v51 = vrot.slane %v1656_v4, %v3302_v3  ;;  %v1671_v46 = vcombine.high %v1663_v25, %v1663_v25 }
 0x13c   : > { %v2472_v12 = vadd.f32 %v2446_v36, %v2408_v20  ;;  %v4021_v30 = vadd.f32 %v2305_v29, %v2262_v41  ;;  %v2448_v50 = vsel %vm2295_vm11, %v2445_v19, %v2447_v27  ;;  %v2484_v44 = vmul.f32 %v3930_v48, %v4003_v40 }
 0x13d   : > { %v1653_v37 = vrot.slane %v1639_v42, %v3302_v3  ;;  %v1654_v11 = vcombine.high %v1646_v8, %v1646_v8  ;;  %v2024_v16 = vcombine.low %v1671_v46, %v4001_v51  ;;  %v2568_v33 = vmul.f32 %v4016_v63, %v4003_v40 }
 0x13e   : > { %v2238_v32 = vsel %vm2230_vm9, %v2236_v61, %v2237_v0  ;;  %v2473_v39 = vadd.f32 %v2448_v50, %v2409_v62  ;;  %v1672_v22 = vcombine.high %v4001_v51, %v4001_v51  ;;  %v2492_v2 = vadd.f32 %v2484_v44, %v2472_v12 }
 0x13f   : > { %v1655_v10 = vcombine.high %v1653_v37, %v1653_v37  ;;  %v2000_v52 = vcombine.low %v1646_v8, %v1654_v11  ;;  %v2022_v34 = vrot.slane %v1653_v37, %v3302_v3  ;;  %v2038_v15 = vrot.slane %v2024_v16, %v3302_v3 }
 0x140   : > { %v2528_v28 = vrot.slane %v2504_v58, 1  ;;  %v2592_v0 = vrot.slane %v2568_v33, 2  ;;  %v2261_v55 = vadd.f32 %v2238_v32, %v3958_v60  ;;  %v4104_v1 = vmul.f32 %v3878_v45, %v4003_v40 }
 0x141   : > { %v2014_v5 = vrot.slane %v2000_v52, %v3302_v3  ;;  %v2023_v59 = vcombine.low %v1655_v10, %v1663_v25  ;;  %v2172_v47 = vsel %vm1854_vm6, %v2022_v34, 0.0  ;;  %vm4152_vm6 = vmand %vm1784_vm14, %vm1790_vm15 }
 0x142   : > { %v4036_v19 = vmul.f32 %v3855_v57, %v2172_v47  ;;  %v4039_v56 = vmul.f32 %v3874_v26, %v2172_v47  ;;  %v4044_v61 = vmul.f32 %v3878_v45, %v2172_v47  ;;  %v4056_v17 = vmul.f32 %v3882_v31, %v2172_v47  ;;  %vm4165_vm8 = vmand %vm4152_vm6, %vm1798_vm4 }
 0x143   : > { %v2015_v49 = vcombine.low %v2007_v18, %v2014_v5  ;;  %v2303_v18 = vsel %vm2295_vm11, %v2301_v54, %v2302_v6  ;;  %v2031_v4 = vrot.slane %v2023_v59, %v3302_v3  ;;  %v2506_v21 = vmul.f32 %v3886_v43, %v2172_v47  ;;  %vm1860_vm12 = vmand %vm4152_vm6, %vm1839_vm7 }
 0x144   : > { %v2570_v8 = vmul.f32 %v4016_v63, %v2172_v47  ;;  %v2244_v6 = vrot.slane %v4036_v19, 1  ;;  %v2309_v20 = vrot.slane %v4039_v56, 2  ;;  %v2388_v46 = vrot.slane %v4044_v61, 1  ;;  %vm1834_vm7 = vmand %vm4137_vm5, %vm1798_vm4 }
 0x145   : > { %v4053_v25 = vsel %vm3986_vm3, %v2015_v49, 0.0  ;;  %v2995_v42 = vpop.f32.mrf.mxu0  ;;  %v2039_v36 = vcombine.low %v2031_v4, %v2038_v15  ;;  %v2531_v29 = vrot.slane %v2506_v21, 1  ;;  %v2326_v33 = vadd.f32 %v2303_v18, %v2261_v55  ;;  %vm4121_vm3 = vmand %vm4092_vm0, %vm1798_vm4 }
 0x146   : > { %v1486_v60 = vadd.f32 %v2995_v42, %v3810_v35  ;;  %v2505_v9 = vmul.f32 %v3886_v43, %v4053_v25  ;;  %v2569_v54 = vmul.f32 %v4016_v63, %v4053_v25  ;;  %v4067_v53 = vmul.f32 %v3855_v57, %v4053_v25 }
 0x147   : > { %v1480_v41 = vpop.f32.mrf.mxu0  ;;  %v2485_v51 = vmul.f32 %v3930_v48, %v4053_v25  ;;  %v2595_v12 = vrot.slane %v2570_v8, 2 }
 0x148   : > { %v1518_v27 = vmax.f32 %v1486_v60, 0.0  ;;  %v1481_v37 = vadd.f32 %v3810_v35, %v1480_v41  ;;  %v2529_v11 = vrot.slane %v2505_v9, 1  ;;  %v2593_v62 = vrot.slane %v2569_v54, 2  ;;  %v4100_v9 = vld [vmem:[%s4536_s6] ss:$0 sm:$0xff] }
 0x149   : > { %v2493_v16 = vadd.f32 %v2485_v51, %v2473_v39  ;;  %v2242_v58 = vrot.slane %v4067_v53, 1 }
 0x14a   : > { %v1690_v10 = vcombine.high %v1518_v27, %v1518_v27  ;;  %v1697_v52 = vrot.slane %v1518_v27, %v3302_v3  ;;  %v1517_v34 = vmax.f32 %v1481_v37, 0.0  ;;  %v2530_v50 = vsel %vm2230_vm9, %v2528_v28, %v2529_v11 }
 0x14b   : > { %v2532_v44 = vsel %vm2230_vm9, %v2529_v11, %v2531_v29  ;;  %v2556_v39 = vadd.f32 %v2530_v50, %v2492_v2  ;;  %v2594_v15 = vsel %vm2295_vm11, %v2592_v0, %v2593_v62  ;;  %v2596_v4 = vsel %vm2295_vm11, %v2593_v62, %v2595_v12 }
 0x14c   : > { %v1704_v5 = vrot.slane %v1690_v10, %v3302_v3  ;;  %v1705_v59 = vcombine.high %v1697_v52, %v1697_v52  ;;  %v1673_v47 = vcombine.high %v1517_v34, %v1517_v34  ;;  %v1680_v32 = vrot.slane %v1517_v34, %v3302_v3 }
 0x14d   : > { %v2557_v49 = vadd.f32 %v2532_v44, %v2493_v16  ;;  %v2620_v60 = vadd.f32 %v2594_v15, %v2556_v39  ;;  %v4114_v62 = vmul.f32 %v3878_v45, %v4053_v25 }
 0x14e   : > { %v1706_v21 = vcombine.high %v1704_v5, %v1704_v5  ;;  %v2064_v42 = vcombine.low %v1697_v52, %v1705_v59  ;;  %v1687_v8 = vrot.slane %v1673_v47, %v3302_v3  ;;  %v1688_v28 = vcombine.high %v1680_v32, %v1680_v32  ;;  %v3001_v18 = vpop.f32.mrf.mxu1 }
 0x14f   : > { %v2040_v2 = vcombine.low %v1672_v22, %v1680_v32  ;;  %v1506_v0 = vadd.f32 %v3001_v18, %v3810_v35  ;;  %v2621_v54 = vadd.f32 %v2596_v4, %v2557_v49  ;;  %v2635_v29 = vadd.f32 %v4100_v9, %v2620_v60 }
 0x150   : > { %v2065_v41 = vcombine.low %v1704_v5, %v1706_v21  ;;  %v1689_v51 = vcombine.high %v1687_v8, %v1687_v8  ;;  %v2041_v27 = vcombine.low %v1688_v28, %v1687_v8  ;;  %v1500_v37 = vpop.f32.mrf.mxu1  ;;  %v2072_v50 = vrot.slane %v2064_v42, %v3302_v3 }
 0x151   : > { %v1522_v22 = vmax.f32 %v1506_v0, 0.0  ;;  %v1501_v11 = vadd.f32 %v3810_v35, %v1500_v37  ;;  %v2636_v34 = vadd.f32 %v4100_v9, %v2621_v54  ;;  %v2048_v44 = vrot.slane %v2040_v2, %v3302_v3 }
 0x152   : > { %v2079_v16 = vrot.slane %v2065_v41, %v3302_v3  ;;  %v2055_v10 = vrot.slane %v2041_v27, %v3302_v3  ;;  %v2063_v52 = vrot.slane %v1689_v51, %v3302_v3  ;;  %v2643_v59 = vmax.f32 %v2635_v29, 0.0 }
 0x153   : > { %v1521_v5 = vmax.f32 %v1501_v11, 0.0  ;;  %v1764_v32 = vrot.slane %v1522_v22, %v3302_v3  ;;  %v2644_v15 = vmax.f32 %v2636_v34, 0.0  ;;  %v2338_v49 = vmul.f32 %v3891_v14, %v4003_v40 }
 0x154   : > { %v4130_v47 = vsel %vm1857_vm2, %v2063_v52, 0.0  ;;  %v2452_v4 = vrot.slane %v4056_v17, 2  ;;  %v2080_v21 = vcombine.low %v2072_v50, %v2079_v16  ;;  %v2056_v42 = vcombine.low %v2048_v44, %v2055_v10  ;;  %3004 = vmatprep.mubr.msk.f32.mxu1 %vm1341_vm1, %v2643_v59 }
 0x155   : > { %v4146_v8 = vsel %vm4121_vm3, %v2039_v36, 0.0  ;;  %v4159_v28 = vmul.f32 %v3855_v57, %v4130_v47  ;;  %v1765_v18 = vcombine.high %v1764_v32, %v1764_v32  ;;  %v1741_v38 = vcombine.high %v1521_v5, %v1521_v5  ;;  %3005 = vmatmul.mubr.msk.f32.vlgmr.msra.gmra.mxu1 %vm1341_vm1, %v2644_v15 }
 0x156   : > { %v2346_v2 = vadd.f32 %v2338_v49, %v2326_v33  ;;  %v4175_v0 = vsel %vm2230_vm9, %v2242_v58, %v2244_v6  ;;  %v4179_v60 = vmul.f32 %v3874_v26, %v4130_v47  ;;  %v2385_v41 = vrot.slane %v4104_v1, 1 }
 0x157   : > { %v2998_v54 = vpop.f32.mrf.mxu0  ;;  %v2386_v33 = vrot.slane %v4114_v62, 1  ;;  %v4189_v19 = vmul.f32 %v3878_v45, %v4130_v47  ;;  %v2145_v6 = vrot.slane %v1765_v18, %v3302_v3  ;;  %v1748_v27 = vrot.slane %v1521_v5, %v3302_v3 }
 0x158   : > { %v1496_v51 = vadd.f32 %v2998_v54, %v3810_v35  ;;  %v4196_v37 = vsel %vm4092_vm0, %v2056_v42, 0.0  ;;  %v4200_v22 = vmul.f32 %v3882_v31, %v4130_v47  ;;  %v4204_v1 = vsel %vm4165_vm8, %v2080_v21, 0.0 }
 0x159   : > { %v1755_v11 = vrot.slane %v1741_v38, %v3302_v3  ;;  %v1490_v29 = vpop.f32.mrf.mxu0  ;;  %v2181_v12 = vsel %vm1863_vm10, %v2145_v6, 0.0  ;;  %v1756_v52 = vcombine.high %v1748_v27, %v1748_v27  ;;  %v4218_v15 = vmul.f32 %v3878_v45, %v4204_v1 }
 0x15a   : > { %v1520_v10 = vmax.f32 %v1496_v51, 0.0  ;;  %v4209_v55 = vmul.f32 %v3886_v43, %v2181_v12  ;;  %v4212_v34 = vmul.f32 %v4016_v63, %v2181_v12  ;;  %v1491_v44 = vadd.f32 %v3810_v35, %v1490_v29 }
 0x15b   : > { %v1757_v50 = vcombine.high %v1755_v11, %v1755_v11  ;;  %v2122_v49 = vcombine.low %v1756_v52, %v1755_v11  ;;  %v2387_v18 = vsel %vm2230_vm9, %v2385_v41, %v2386_v33  ;;  %v4225_v36 = vmul.f32 %v3882_v31, %v4053_v25 }
 0x15c   : > { %v1724_v5 = vcombine.high %v1520_v10, %v1520_v10  ;;  %v1731_v59 = vrot.slane %v1520_v10, %v3302_v3  ;;  %v1519_v42 = vmax.f32 %v1491_v44, 0.0  ;;  %v2423_v11 = vmul.f32 %v3882_v31, %v4003_v40 }
 0x15d   : > { %v2123_v21 = vcombine.low %v1757_v50, %v1764_v32  ;;  %v2130_v6 = vrot.slane %v2122_v49, %v3302_v3  ;;  %v2410_v13 = vadd.f32 %v2387_v18, %v2346_v2  ;;  %v2486_v24 = vmul.f32 %v3930_v48, %v4146_v8 }
 0x15e   : > { %v1738_v35 = vrot.slane %v1724_v5, %v3302_v3  ;;  %v1739_v38 = vcombine.high %v1731_v59, %v1731_v59  ;;  %v2104_v54 = vrot.slane %v1731_v59, %v3302_v3  ;;  %v1707_v41 = vcombine.high %v1519_v42, %v1519_v42 }
 0x15f   : > { %v2137_v32 = vrot.slane %v2123_v21, %v3302_v3  ;;  %v1714_v52 = vrot.slane %v1519_v42, %v3302_v3  ;;  %v2450_v5 = vrot.slane %v4225_v36, 2  ;;  %v2507_v39 = vmul.f32 %v3886_v43, %v4146_v8 }
 0x160   : > { %v2105_v12 = vcombine.low %v1739_v38, %v1738_v35  ;;  %v1740_v10 = vcombine.high %v1738_v35, %v1738_v35  ;;  %v2178_v59 = vsel %vm1860_vm12, %v2104_v54, 0.0  ;;  %v1721_v51 = vrot.slane %v1707_v41, %v3302_v3 }
 0x161   : > { %v2138_v21 = vcombine.low %v2130_v6, %v2137_v32  ;;  %v2449_v38 = vrot.slane %v2423_v11, 2  ;;  %v1722_v2 = vcombine.high %v1714_v52, %v1714_v52  ;;  %v2339_v16 = vmul.f32 %v3891_v14, %v4053_v25 }
 0x162   : > { %v2106_v49 = vcombine.low %v1740_v10, %v1748_v27  ;;  %v2113_v35 = vrot.slane %v2105_v12, %v3302_v3  ;;  %v1723_v18 = vcombine.high %v1721_v51, %v1721_v51  ;;  %v4253_v27 = vmul.f32 %v3878_v45, %v2178_v59 }
 0x163   : > { %v4250_v44 = vsel %vm4137_vm5, %v2138_v21, 0.0  ;;  %v2451_v6 = vsel %vm2295_vm11, %v2449_v38, %v2450_v5  ;;  %v2081_v41 = vcombine.low %v1714_v52, %v1722_v2  ;;  %v4269_v10 = vmul.f32 %v3886_v43, %v2178_v59 }
 0x164   : > { %v2120_v42 = vrot.slane %v2106_v49, %v3302_v3  ;;  %v4261_v36 = vmul.f32 %v3886_v43, %v4250_v44  ;;  %v4265_v54 = vmul.f32 %v4016_v63, %v4250_v44  ;;  %v2082_v11 = vcombine.low %v1721_v51, %v1723_v18 }
 0x165   : > { %v2474_v12 = vadd.f32 %v2451_v6, %v2410_v13  ;;  %v2508_v49 = vmul.f32 %v3886_v43, %v4196_v37  ;;  %v2089_v38 = vrot.slane %v2081_v41, %v3302_v3  ;;  %v2571_v51 = vmul.f32 %v4016_v63, %v4146_v8 }
 0x166   : > { %v2121_v32 = vcombine.low %v2113_v35, %v2120_v42  ;;  %v2096_v52 = vrot.slane %v2082_v11, %v3302_v3  ;;  %v4284_v13 = vmul.f32 %v4016_v63, %v2178_v59  ;;  %v2533_v6 = vrot.slane %v2507_v39, 1 }
 0x167   : > { %v2494_v2 = vadd.f32 %v2486_v24, %v2474_v12  ;;  %v2572_v3 = vmul.f32 %v4016_v63, %v4196_v37  ;;  %v4298_v11 = vmul.f32 %v3882_v31, %v2178_v59  ;;  %v2597_v24 = vrot.slane %v2571_v51, 2 }
 0x168   : > { %v4277_v21 = vsel %vm1834_vm7, %v2121_v32, 0.0  ;;  %v2097_v18 = vcombine.low %v2089_v38, %v2096_v52  ;;  %v2534_v32 = vrot.slane %v2508_v49, 1  ;;  %v2544_v38 = vrot.slane %v4261_v36, 1 }
 0x169   : > { %v4288_v35 = vmul.f32 %v3886_v43, %v4277_v21  ;;  %v4292_v42 = vmul.f32 %v4016_v63, %v4277_v21  ;;  %v2598_v39 = vrot.slane %v2572_v3, 2  ;;  %v2389_v59 = vsel %vm2230_vm9, %v2386_v33, %v2388_v46 }
 0x16a   : > { %v4305_v50 = vsel %vm4152_vm6, %v2097_v18, 0.0  ;;  %v2535_v12 = vsel %vm2230_vm9, %v2533_v6, %v2534_v32  ;;  %v2347_v51 = vadd.f32 %v2339_v16, %v4021_v30  ;;  %v2509_v46 = vmul.f32 %v3886_v43, %v4130_v47 }
 0x16b   : > { %v2558_v52 = vadd.f32 %v2535_v12, %v2494_v2  ;;  %v2543_v41 = vrot.slane %v4288_v35, 1  ;;  %v2599_v18 = vsel %vm2295_vm11, %v2597_v24, %v2598_v39  ;;  %v4321_v6 = vmul.f32 %v3878_v45, %v4305_v50 }
 0x16c   : > { %v4325_v2 = vmul.f32 %v3882_v31, %v4305_v50  ;;  %v2411_v62 = vadd.f32 %v2389_v59, %v2347_v51  ;;  %v2453_v33 = vsel %vm2295_vm11, %v2450_v5, %v2452_v4  ;;  %v2573_v30 = vmul.f32 %v4016_v63, %v4130_v47 }
 0x16d   : > { %v2622_v61 = vadd.f32 %v2599_v18, %v2558_v52  ;;  %v2212_v16 = vmul.f32 %v3855_v57, %v4003_v40  ;;  %v2487_v12 = vmul.f32 %v3930_v48, %v4196_v37  ;;  %v2277_v24 = vmul.f32 %v3874_v26, %v4003_v40 }
 0x16e   : > { %v2278_v52 = vmul.f32 %v3874_v26, %v4053_v25  ;;  %v2475_v17 = vadd.f32 %v2453_v33, %v2411_v62  ;;  %v2536_v59 = vrot.slane %v2509_v46, 1  ;;  %v2190_v4 = vmul.f32 %v3869_v7, %v4003_v40 }
 0x16f   : > { %v2637_v3 = vadd.f32 %v4100_v9, %v2622_v61  ;;  %v2241_v47 = vrot.slane %v2212_v16, 1  ;;  %v2600_v18 = vrot.slane %v2573_v30, 2  ;;  %v2340_v61 = vmul.f32 %v3891_v14, %v4146_v8 }
 0x170   : > { %v2307_v51 = vrot.slane %v2278_v52, 2  ;;  %v2495_v49 = vadd.f32 %v2487_v12, %v2475_v17  ;;  %v2306_v23 = vrot.slane %v2277_v24, 2  ;;  %v2362_v62 = vmul.f32 %v3878_v45, %v4146_v8 }
 0x171   : > { %v2645_v5 = vmax.f32 %v2637_v3, 0.0  ;;  %v2243_v29 = vsel %vm2230_vm9, %v2241_v47, %v2242_v58  ;;  %v2537_v40 = vsel %vm2230_vm9, %v2534_v32, %v2536_v59  ;;  %v2601_v46 = vsel %vm2295_vm11, %v2598_v39, %v2600_v18 }
 0x172   : > { %v2263_v33 = vadd.f32 %v2243_v29, %v2190_v4  ;;  %v2363_v30 = vmul.f32 %v3878_v45, %v4196_v37  ;;  %v2559_v16 = vadd.f32 %v2537_v40, %v2495_v49  ;;  %v2308_v3 = vsel %vm2295_vm11, %v2306_v23, %v2307_v51 }
 0x173   : > { %3007 = vmatprep.mubr.msk.f32.mxu1 %vm1341_vm1, %v2645_v5  ;;  %v2426_v53 = vmul.f32 %v3882_v31, %v4146_v8  ;;  %v2427_v58 = vmul.f32 %v3882_v31, %v4196_v37  ;;  %v2390_v24 = vrot.slane %v2362_v62, 1  ;;  %v2510_v32 = vmul.f32 %v3886_v43, %v4204_v1 }
 0x174   : > { %v2328_v12 = vadd.f32 %v2308_v3, %v2263_v33  ;;  %v2391_v52 = vrot.slane %v2363_v30, 1  ;;  %v2623_v39 = vadd.f32 %v2601_v46, %v2559_v16  ;;  %v2511_v45 = vmul.f32 %v3886_v43, %v4305_v50 }
 0x175   : > { %v2455_v29 = vrot.slane %v2427_v58, 2  ;;  %v2574_v49 = vmul.f32 %v4016_v63, %v4204_v1  ;;  %v4370_v23 = vmul.f32 %v3891_v14, %v4305_v50  ;;  %v2396_v17 = vrot.slane %v4321_v6, 1 }
 0x176   : > { %v2348_v59 = vadd.f32 %v2340_v61, %v2328_v12  ;;  %v4375_v4 = vmul.f32 %v4016_v63, %v4305_v50  ;;  %v2638_v47 = vadd.f32 %v4100_v9, %v2623_v39  ;;  %v2392_v5 = vsel %vm2230_vm9, %v2390_v24, %v2391_v52 }
 0x177   : > { %v2454_v18 = vrot.slane %v2426_v53, 2  ;;  %v2539_v43 = vrot.slane %v2511_v45, 1  ;;  %v2460_v62 = vrot.slane %v4325_v2, 2  ;;  %v2191_v33 = vmul.f32 %v3869_v7, %v4053_v25 }
 0x178   : > { %v2412_v40 = vadd.f32 %v2392_v5, %v2348_v59  ;;  %v2603_v46 = vrot.slane %v4375_v4, 2  ;;  %v2646_v30 = vmax.f32 %v2638_v47, 0.0  ;;  %v2538_v16 = vrot.slane %v2510_v32, 1 }
 0x179   : > { %v2456_v61 = vsel %vm2295_vm11, %v2454_v18, %v2455_v29  ;;  %v2602_v63 = vrot.slane %v2574_v49, 2  ;;  %v2488_v58 = vmul.f32 %v3930_v48, %v4204_v1  ;;  %v2264_v53 = vadd.f32 %v4175_v0, %v2191_v33 }
 0x17a   : > { %v2476_v3 = vadd.f32 %v2456_v61, %v2412_v40  ;;  %v2310_v12 = vsel %vm2295_vm11, %v2307_v51, %v2309_v20  ;;  %3008 = vmatmul.mubr.msk.f32.gmra.mxu1 %vm1341_vm1, %v2646_v30  ;;  %v2540_v24 = vsel %vm2230_vm9, %v2538_v16, %v2539_v43  ;;  %v2341_v32 = vmul.f32 %v3891_v14, %v4196_v37 }
 0x17b   : > { %v2604_v25 = vsel %vm2295_vm11, %v2602_v63, %v2603_v46  ;;  %v4568_v39 = vrot.slane %v4189_v19, 1  ;;  %v2329_v59 = vadd.f32 %v2310_v12, %v2264_v53  ;;  %v2215_v56 = vmul.f32 %v3855_v57, %v4146_v8 }
 0x17c   : > { %v2496_v49 = vadd.f32 %v2488_v58, %v2476_v3  ;;  %v2216_v20 = vmul.f32 %v3855_v57, %v4196_v37  ;;  %v4569_v0 = vrot.slane %v4200_v22, 2  ;;  %v2489_v4 = vmul.f32 %v3930_v48, %v4305_v50 }
 0x17d   : > { %v2394_v45 = vsel %vm2230_vm9, %v2391_v52, %v4568_v39  ;;  %v2280_v19 = vmul.f32 %v3874_v26, %v4146_v8  ;;  %v2281_v52 = vmul.f32 %v3874_v26, %v4196_v37  ;;  %v2349_v5 = vadd.f32 %v2341_v32, %v2329_v59 }
 0x17e   : > { %v2458_v51 = vsel %vm2295_vm11, %v2455_v29, %v4569_v0  ;;  %v2560_v47 = vadd.f32 %v2540_v24, %v2496_v49  ;;  %v2246_v18 = vrot.slane %v2215_v56, 1  ;;  %v2247_v40 = vrot.slane %v2216_v20, 1 }
 0x17f   : > { %v2192_v57 = vmul.f32 %v3869_v7, %v4146_v8  ;;  %v2311_v33 = vrot.slane %v2280_v19, 2  ;;  %v2312_v22 = vrot.slane %v2281_v52, 2  ;;  %v2545_v50 = vsel %vm2230_vm9, %v2543_v41, %v2544_v38 }
 0x180   : > { %v2624_v29 = vadd.f32 %v2604_v25, %v2560_v47  ;;  %v2413_v30 = vadd.f32 %v2394_v45, %v2349_v5  ;;  %v2248_v61 = vsel %vm2230_vm9, %v2246_v18, %v2247_v40  ;;  %v2608_v26 = vrot.slane %v4265_v54, 2 }
 0x181   : > { %v2265_v16 = vadd.f32 %v2248_v61, %v2192_v57  ;;  %v2313_v63 = vsel %vm2295_vm11, %v2311_v33, %v2312_v22  ;;  %v2429_v8 = vmul.f32 %v3882_v31, %v4204_v1  ;;  %v2193_v3 = vmul.f32 %v3869_v7, %v4196_v37  ;;  %v3060_v61 = vld [vmem:[%s3232_s25 + $0x3a] sm:$0xff] }
 0x182   : > { %v2639_v58 = vadd.f32 %v4100_v9, %v2624_v29  ;;  %v2477_v35 = vadd.f32 %v2458_v51, %v2413_v30  ;;  %v4570_v41 = vrot.slane %v4292_v42, 2  ;;  %v4571_v12 = vrot.slane %v4159_v28, 1 }
 0x183   : > { %v4572_v24 = vrot.slane %v4269_v10, 1  ;;  %v2330_v32 = vadd.f32 %v2313_v63, %v2265_v16  ;;  %v2342_v31 = vmul.f32 %v3891_v14, %v4204_v1  ;;  %v4573_v42 = vrot.slane %v4218_v15, 1  ;;  %v3061_v63 = vld [vmem:[%s3232_s25 + $0x32] sm:$0xff] }
 0x184   : > { %v2609_v53 = vsel %vm2295_vm11, %v4570_v41, %v2608_v26  ;;  %v2250_v54 = vsel %vm2230_vm9, %v2247_v40, %v4571_v12  ;;  %v2647_v37 = vmax.f32 %v2639_v58, 0.0  ;;  %v2497_v39 = vadd.f32 %v2489_v4, %v2477_v35  ;;  %v3062_v12 = vld [vmem:[%s3232_s25 + $0x52] sm:$0xff] }
 0x185   : > { %v2542_v25 = vsel %vm2230_vm9, %v2539_v43, %v4572_v24  ;;  %v2266_v7 = vadd.f32 %v2250_v54, %v2193_v3  ;;  %v2397_v45 = vsel %vm2230_vm9, %v4573_v42, %v2396_v17  ;;  %v4574_v28 = vrot.slane %v4179_v60, 2 }
 0x186   : > { %v2350_v10 = vadd.f32 %v2342_v31, %v2330_v32  ;;  %v4575_v43 = vrot.slane %v4209_v55, 1  ;;  %v4576_v1 = vrot.slane %v4212_v34, 2  ;;  %3010 = vmatprep.mubr.msk.f32.mxu1 %vm1341_vm1, %v2647_v37  ;;  %v2561_v15 = vadd.f32 %v2542_v25, %v2497_v39  ;;  %v3063_v25 = vld [vmem:[%s3232_s25 + $0x4a] sm:$0xff] }
 0x187   : > { %v2315_v49 = vsel %vm2295_vm11, %v2312_v22, %v4574_v28  ;;  %v2459_v20 = vrot.slane %v2429_v8, 2  ;;  %v4577_v60 = vrot.slane %v4253_v27, 1  ;;  %v4578_v55 = vrot.slane %v4284_v13, 2 }
 0x188   : > { %v2331_v59 = vadd.f32 %v2315_v49, %v2266_v7  ;;  %v2547_v14 = vsel %vm2230_vm9, %v2544_v38, %v4575_v43  ;;  %v2611_v56 = vsel %vm2295_vm11, %v2608_v26, %v4576_v1  ;;  %v2414_v51 = vadd.f32 %v2397_v45, %v2350_v10  ;;  %v3064_v45 = vld [vmem:[%s3232_s25 + $0x6a] sm:$0xff]  ;;  %v3065_v10 = vld [vmem:[%s3232_s25 + $0x62] sm:$0xff] }
 0x189   : > { %v2399_v0 = vsel %vm2230_vm9, %v2396_v17, %v4577_v60  ;;  %v2606_v36 = vsel %vm2295_vm11, %v2603_v46, %v4578_v55  ;;  %v2462_v34 = vrot.slane %v4298_v11, 2  ;;  %v2461_v19 = vsel %vm2295_vm11, %v2459_v20, %v2460_v62  ;;  %v3066_v20 = vld [vmem:[%s3232_s25 + $0x82] sm:$0xff]  ;;  %v3067_v55 = vld [vmem:[%s3232_s25 + $0x7a] sm:$0xff] }
 0x18a   : > { %v2351_v38 = vadd.f32 %v4370_v23, %v2331_v59  ;;  %v2625_v4 = vadd.f32 %v2606_v36, %v2561_v15  ;;  %v2490_v27 = vmul.f32 %v3930_v48, %v4277_v21  ;;  %v2478_v6 = vadd.f32 %v2461_v19, %v2414_v51 }
 0x18b   : > { %v2463_v13 = vsel %vm2295_vm11, %v2460_v62, %v2462_v34  ;;  %v2491_v23 = vmul.f32 %v3930_v48, %v4250_v44  ;;  %v2943_v44 = vld [vmem:[%s4538_s8] ss:$0 sm:$0xff] }
 0x18c   : > { %v2415_v52 = vadd.f32 %v2399_v0, %v2351_v38  ;;  %v2640_v17 = vadd.f32 %v4100_v9, %v2625_v4  ;;  %v2498_v11 = vadd.f32 %v2490_v27, %v2478_v6 }
 0x18e   : > { %v2479_v46 = vadd.f32 %v2463_v13, %v2415_v52  ;;  %v2648_v47 = vmax.f32 %v2640_v17, 0.0  ;;  %v2562_v5 = vadd.f32 %v2545_v50, %v2498_v11 }
 0x190   : > { %v2499_v18 = vadd.f32 %v2491_v23, %v2479_v46  ;;  %3011 = vmatmul.mubr.msk.f32.gmra.mxu1 %vm1341_vm1, %v2648_v47  ;;  %v2626_v21 = vadd.f32 %v2609_v53, %v2562_v5 }
 0x192   : > { %v2563_v40 = vadd.f32 %v2547_v14, %v2499_v18  ;;  %v2641_v57 = vadd.f32 %v4100_v9, %v2626_v21 }
 0x194   : > { %v2627_v2 = vadd.f32 %v2611_v56, %v2563_v40  ;;  %v2649_v33 = vmax.f32 %v2641_v57, 0.0 }
 0x196   : > { %v2642_v62 = vadd.f32 %v4100_v9, %v2627_v2  ;;  %3013 = vmatprep.mubr.msk.f32.mxu1 %vm1341_vm1, %v2649_v33 }
 0x198   : > { %v2650_v48 = vmax.f32 %v2642_v62, 0.0 }
 0x19a   : > { %3014 = vmatmul.mubr.msk.f32.gmra.mxu1 %vm1341_vm1, %v2650_v48 }
 0x215   : > { %v3006_v22 = vpop.f32.mrf.mxu1 }
 0x216   : > { %v2758_v50 = vadd.f32 %v3006_v22, %v2943_v44 }
 0x217   : > { %v2752_v9 = vpop.f32.mrf.mxu1 }
 0x218   : > { %v2792_v29 = vmax.f32 %v2758_v50, 0.0  ;;  %v2753_v30 = vadd.f32 %v2943_v44, %v2752_v9 }
 0x21a   : > { %v2800_v26 = vadd.f32 %v3060_v61, %v2792_v29  ;;  %v2791_v16 = vmax.f32 %v2753_v30, 0.0 }
 0x21c   : > { %2808 = vst.msk [vmem:[%s4489_s22 + $0x8] sm:$0xff] %vm1341_vm1, %v2800_v26  ;;  %v2799_v8 = vadd.f32 %v3061_v63, %v2791_v16 }
 0x21e   : > { %2807 = vst.msk [vmem:[%s4489_s22] sm:$0xff] %vm1341_vm1, %v2799_v8 }
 0x23a   : > { %v3009_v3 = vpop.f32.mrf.mxu1 }
 0x23b   : > { %v2768_v58 = vadd.f32 %v3009_v3, %v2943_v44 }
 0x23c   : > { %v2762_v35 = vpop.f32.mrf.mxu1 }
 0x23d   : > { %v2794_v41 = vmax.f32 %v2768_v58, 0.0  ;;  %v2763_v53 = vadd.f32 %v2943_v44, %v2762_v35 }
 0x23f   : > { %v2802_v54 = vadd.f32 %v3062_v12, %v2794_v41  ;;  %v2793_v24 = vmax.f32 %v2763_v53, 0.0 }
 0x241   : > { %2810 = vst.msk [vmem:[%s4489_s22 + $0x18] sm:$0xff] %vm1341_vm1, %v2802_v54  ;;  %v2801_v32 = vadd.f32 %v3063_v25, %v2793_v24 }
 0x243   : > { %2809 = vst.msk [vmem:[%s4489_s22 + $0x10] sm:$0xff] %vm1341_vm1, %v2801_v32 }
 0x250   : > { %v3012_v31 = vpop.f32.mrf.mxu1 }
 0x251   : > { %v2778_v7 = vadd.f32 %v3012_v31, %v2943_v44 }
 0x252   : > { %v2772_v37 = vpop.f32.mrf.mxu1 }
 0x253   : > { %v2796_v39 = vmax.f32 %v2778_v7, 0.0  ;;  %v2773_v42 = vadd.f32 %v2943_v44, %v2772_v37 }
 0x255   : > { %v2804_v28 = vadd.f32 %v3064_v45, %v2796_v39  ;;  %v2795_v49 = vmax.f32 %v2773_v42, 0.0 }
 0x257   : > { %2812 = vst.msk [vmem:[%s4489_s22 + $0x28] sm:$0xff] %vm1341_vm1, %v2804_v28  ;;  %v2803_v59 = vadd.f32 %v3065_v10, %v2795_v49 }
 0x259   : > { %2811 = vst.msk [vmem:[%s4489_s22 + $0x20] sm:$0xff] %vm1341_vm1, %v2803_v59 }
 0x25a   : > { %v3015_v43 = vpop.f32.mrf.mxu1 }
 0x25b   : > { %v2788_v14 = vadd.f32 %v3015_v43, %v2943_v44 }
 0x25c   : > { %v2782_v1 = vpop.f32.mrf.mxu1 }
 0x25d   : > { %v2798_v56 = vmax.f32 %v2788_v14, 0.0  ;;  %v2783_v15 = vadd.f32 %v2943_v44, %v2782_v1 }
 0x25f   : > { %v2806_v60 = vadd.f32 %v3066_v20, %v2798_v56  ;;  %v2797_v0 = vmax.f32 %v2783_v15, 0.0 }
 0x261   : > { %2814 = vst.msk [vmem:[%s4489_s22 + $0x38] sm:$0xff] %vm1341_vm1, %v2806_v60  ;;  %v2805_v36 = vadd.f32 %v3067_v55, %v2797_v0 }
 0x263   : > { %2813 = vst.msk [vmem:[%s4489_s22 + $0x30] sm:$0xff] %vm1341_vm1, %v2805_v36 }
 0x264 PF: > { %s19_s13 = sadd.s32 1, %s3106_s13   ;;  %s4579_s30 = smov %s3098_s11 }
 0x265   : > { %p16_p7 = scmp.ge.s32.totalorder %s19_s13, 10   ;;  %s4580_s10 = smov %s3102_s12 }
 0x266   : > { %s4581_s11 = smov %s4584_s14  ;;  %s4582_s12 = smov %s4588_s15 }
 0x267   :  { %18 = sbr.rel (!%p16_p7) target bundleno = 3 (0x3), region = 87 }

</bundles_post_ra>
